<compile_context>
chip_gen: v6e
topology: v6e:2x2x1
jax: 0.10.0
libtpu: 0.0.40
codegen_flags: <defaults>
</compile_context>

<pallas_src>
import functools

import jax
import jax.numpy as jnp
from jax.experimental import pallas as pl
from jax.experimental.pallas import tpu as pltpu


def _round_up(a, m):
    return ((a + m - 1) // m) * m


def _sub_decoder_kernel(x_ref, w1_ref, b1_ref, w2_ref, b2_ref, o_ref, *, sub):
    # x_ref:  (TM, IN_CH2) f32 tile of point features
    # w1_ref: (IN_CH2, OUT_CH) f32, b1_ref: (1, OUT_CH) f32
    # w2_ref: (OUT_CH, OUT_CH) f32, b2_ref: (1, OUT_CH) f32
    # o_ref:  (TM, OUT_CH) output tile
    w1 = w1_ref[...]
    w2 = w2_ref[...]
    b1 = b1_ref[...]
    b2 = b2_ref[...]

    tm = x_ref.shape[0]
    n_sub = tm // sub
    # Static sub-blocking: each [sub, OUT_CH] intermediate stays in vregs
    # between the two MXU matmuls (sub=128, 64 lanes -> ~16 padded vregs).
    for s in range(n_sub):
        lo = s * sub
        x = x_ref[lo:lo + sub, :]                                      # f32
        h = jnp.dot(x, w1, preferred_element_type=jnp.float32) + b1    # f32 acc
        h = jnp.maximum(h, 0.0)                                        # ReLU
        y = jnp.dot(h, w2, preferred_element_type=jnp.float32) + b2    # f32 acc
        y = jnp.maximum(y, 0.0)                                        # ReLU
        o_ref[lo:lo + sub, :] = y.astype(o_ref.dtype)


def sub_decoder_geo_lossl2(x, w1, b1, w2, b2, *, tm=2048, sub=128, out_dtype=None):
    """x: [N, in_ch2] point features. Returns [N, out_ch] = relu(relu(xW1+b1)W2+b2)."""
    n, in_ch2 = x.shape
    out_ch = w1.shape[1]
    out_dtype = x.dtype if out_dtype is None else out_dtype

    # Clamp tm so the grid keeps >= 2 steps (v7x megacore occupancy) while
    # staying as large as possible to amortize per-grid-step overhead.
    tm = max(256, min(tm, _round_up(pl.cdiv(n, 2), 256)))
    sub = min(sub, tm)
    assert tm % sub == 0, "tm must be a multiple of the inner sub-block"
    assert tm % 8 == 0, "tm must be a multiple of 8 (f32 sublane tiling)"

    n_tiles = pl.cdiv(n, tm)   # partial last tile handled by Pallas masking

    b1f = jnp.asarray(b1, dtype=x.dtype).reshape(1, out_ch)
    b2f = jnp.asarray(b2, dtype=x.dtype).reshape(1, out_ch)

    kernel = functools.partial(_sub_decoder_kernel, sub=sub)

    return pl.pallas_call(
        kernel,
        out_shape=jax.ShapeDtypeStruct((n, out_ch), out_dtype),
        grid_spec=pltpu.PrefetchScalarGridSpec(
            num_scalar_prefetch=0,
            grid=(n_tiles,),
            in_specs=[
                pl.BlockSpec((tm, in_ch2), lambda i: (i, 0)),       # x tile (streams)
                pl.BlockSpec((in_ch2, out_ch), lambda i: (0, 0)),   # W1 (index-invariant)
                pl.BlockSpec((1, out_ch), lambda i: (0, 0)),        # b1
                pl.BlockSpec((out_ch, out_ch), lambda i: (0, 0)),   # W2 (index-invariant)
                pl.BlockSpec((1, out_ch), lambda i: (0, 0)),        # b2
            ],
            out_specs=pl.BlockSpec((tm, out_ch), lambda i: (i, 0)),
        ),
        compiler_params=pltpu.CompilerParams(
            dimension_semantics=("parallel",)),
    )(x, w1, b1f, w2, b2f)


if __name__ == "__main__":
    # Shapes consistent with the module: in_ch2 = 32, out_ch = 64, act = ReLU.
    # N is NOT a multiple of the row tile (exercises the partial last block)
    # and large enough that the clamped grid has 2 steps (v7x megacore).
    N = 1000
    IN_CH2 = 32
    OUT_CH = 64

    key = jax.random.PRNGKey(0)
    kx, k1, k2, k3, k4 = jax.random.split(key, 5)

    x = jax.random.normal(kx, (N, IN_CH2), dtype=jnp.float32)

    # Deterministic synthetic parameters (Kaiming-ish scale).
    w1 = jax.random.normal(k1, (IN_CH2, OUT_CH), dtype=jnp.float32) * (1.0 / IN_CH2 ** 0.5)
    b1 = jax.random.normal(k2, (1, OUT_CH), dtype=jnp.float32) * 0.1
    w2 = jax.random.normal(k3, (OUT_CH, OUT_CH), dtype=jnp.float32) * (1.0 / OUT_CH ** 0.5)
    b2 = jax.random.normal(k4, (1, OUT_CH), dtype=jnp.float32) * 0.1

    out = sub_decoder_geo_lossl2(x, w1, b1, w2, b2)
    out = jax.block_until_ready(out)

    # Pure-JAX f32 reference (same math as the PyTorch module's forward).
    h_ref = jnp.maximum(
        jnp.dot(x, w1, preferred_element_type=jnp.float32,
                precision=jax.lax.Precision.HIGHEST) + b1, 0.0)
    ref = jnp.maximum(
        jnp.dot(h_ref, w2, preferred_element_type=jnp.float32,
                precision=jax.lax.Precision.HIGHEST) + b2, 0.0)

    assert out.shape == (N, OUT_CH)
    assert out.dtype == x.dtype
    assert jnp.allclose(out, ref, atol=1e-2, rtol=1e-2)

    print("KERNEL_OK")
</pallas_src>

<mosaic_0001>
module attributes {stable_mosaic.version = 11 : i64} {
  func.func @_sub_decoder_kernel(%arg0: i32, %arg1: memref<512x32xf32, #tpu.memory_space<vmem>>, %arg2: memref<32x64xf32, #tpu.memory_space<vmem>>, %arg3: memref<1x64xf32, #tpu.memory_space<vmem>>, %arg4: memref<64x64xf32, #tpu.memory_space<vmem>>, %arg5: memref<1x64xf32, #tpu.memory_space<vmem>>, %arg6: memref<512x64xf32, #tpu.memory_space<vmem>>) attributes {dimension_semantics = [#tpu.dimension_semantics<parallel>], iteration_bounds = array<i64: 2>, scalar_prefetch = 0 : i64, scratch_operands = 0 : i64, tpu.core_type = #tpu.core_type<tc>, window_params = [{transform_indices = @transform_0, window_bounds = array<i64: 512, 32>}, {pipeline_mode = #tpu.pipeline_mode<synchronous>, transform_indices = @transform_1, window_bounds = array<i64: 32, 64>}, {pipeline_mode = #tpu.pipeline_mode<synchronous>, transform_indices = @transform_2, window_bounds = array<i64: 1, 64>}, {pipeline_mode = #tpu.pipeline_mode<synchronous>, transform_indices = @transform_3, window_bounds = array<i64: 64, 64>}, {pipeline_mode = #tpu.pipeline_mode<synchronous>, transform_indices = @transform_4, window_bounds = array<i64: 1, 64>}, {transform_indices = @transform_5, window_bounds = array<i64: 512, 64>}]} {
    %c0 = arith.constant 0 : index
    %c0_0 = arith.constant 0 : index
    %0 = vector.load %arg2[%c0, %c0_0] : memref<32x64xf32, #tpu.memory_space<vmem>>, vector<32x64xf32>
    %c0_1 = arith.constant 0 : index
    %c0_2 = arith.constant 0 : index
    %1 = vector.load %arg4[%c0_1, %c0_2] : memref<64x64xf32, #tpu.memory_space<vmem>>, vector<64x64xf32>
    %c0_3 = arith.constant 0 : index
    %c0_4 = arith.constant 0 : index
    %2 = vector.load %arg3[%c0_3, %c0_4] : memref<1x64xf32, #tpu.memory_space<vmem>>, vector<1x64xf32>
    %c0_5 = arith.constant 0 : index
    %c0_6 = arith.constant 0 : index
    %3 = vector.load %arg5[%c0_5, %c0_6] : memref<1x64xf32, #tpu.memory_space<vmem>>, vector<1x64xf32>
    %c0_7 = arith.constant 0 : index
    %c0_8 = arith.constant 0 : index
    %4 = vector.load %arg1[%c0_7, %c0_8] : memref<512x32xf32, #tpu.memory_space<vmem>>, vector<128x32xf32>
    %cst = arith.constant dense<0.000000e+00> : vector<128x64xf32>
    %5 = tpu.matmul %4, %0, %cst {dimension_numbers = #tpu.dot_dimension_numbers<[1], [0], [0], [1], [0, 0, 1, 1], [], []>} : vector<128x32xf32>, vector<32x64xf32>, vector<128x64xf32> -> vector<128x64xf32>
    %6 = vector.broadcast %2 : vector<1x64xf32> to vector<128x64xf32>
    %7 = arith.addf %5, %6 : vector<128x64xf32>
    %cst_9 = arith.constant 0.000000e+00 : f32
    %8 = vector.broadcast %cst_9 : f32 to vector<128x64xf32>
    %9 = arith.maximumf %7, %8 : vector<128x64xf32>
    %cst_10 = arith.constant dense<0.000000e+00> : vector<128x64xf32>
    %10 = tpu.matmul %9, %1, %cst_10 {dimension_numbers = #tpu.dot_dimension_numbers<[1], [0], [0], [1], [0, 0, 1, 1], [], []>} : vector<128x64xf32>, vector<64x64xf32>, vector<128x64xf32> -> vector<128x64xf32>
    %11 = vector.broadcast %3 : vector<1x64xf32> to vector<128x64xf32>
    %12 = arith.addf %10, %11 : vector<128x64xf32>
    %cst_11 = arith.constant 0.000000e+00 : f32
    %13 = vector.broadcast %cst_11 : f32 to vector<128x64xf32>
    %14 = arith.maximumf %12, %13 : vector<128x64xf32>
    %c0_12 = arith.constant 0 : index
    %c0_13 = arith.constant 0 : index
    %15 = vector.load %arg6[%c0_12, %c0_13] : memref<512x64xf32, #tpu.memory_space<vmem>>, vector<128x64xf32>
    tpu.vector_store %arg6[%c0_12, %c0_13], %14 {strides = array<i32>} : memref<512x64xf32, #tpu.memory_space<vmem>>, vector<128x64xf32>,
    %c128 = arith.constant 128 : index
    %c0_14 = arith.constant 0 : index
    %16 = vector.load %arg1[%c128, %c0_14] : memref<512x32xf32, #tpu.memory_space<vmem>>, vector<128x32xf32>
    %cst_15 = arith.constant dense<0.000000e+00> : vector<128x64xf32>
    %17 = tpu.matmul %16, %0, %cst_15 {dimension_numbers = #tpu.dot_dimension_numbers<[1], [0], [0], [1], [0, 0, 1, 1], [], []>} : vector<128x32xf32>, vector<32x64xf32>, vector<128x64xf32> -> vector<128x64xf32>
    %18 = vector.broadcast %2 : vector<1x64xf32> to vector<128x64xf32>
    %19 = arith.addf %17, %18 : vector<128x64xf32>
    %cst_16 = arith.constant 0.000000e+00 : f32
    %20 = vector.broadcast %cst_16 : f32 to vector<128x64xf32>
    %21 = arith.maximumf %19, %20 : vector<128x64xf32>
    %cst_17 = arith.constant dense<0.000000e+00> : vector<128x64xf32>
    %22 = tpu.matmul %21, %1, %cst_17 {dimension_numbers = #tpu.dot_dimension_numbers<[1], [0], [0], [1], [0, 0, 1, 1], [], []>} : vector<128x64xf32>, vector<64x64xf32>, vector<128x64xf32> -> vector<128x64xf32>
    %23 = vector.broadcast %3 : vector<1x64xf32> to vector<128x64xf32>
    %24 = arith.addf %22, %23 : vector<128x64xf32>
    %cst_18 = arith.constant 0.000000e+00 : f32
    %25 = vector.broadcast %cst_18 : f32 to vector<128x64xf32>
    %26 = arith.maximumf %24, %25 : vector<128x64xf32>
    %c128_19 = arith.constant 128 : index
    %c0_20 = arith.constant 0 : index
    %27 = vector.load %arg6[%c128_19, %c0_20] : memref<512x64xf32, #tpu.memory_space<vmem>>, vector<128x64xf32>
    tpu.vector_store %arg6[%c128_19, %c0_20], %26 {strides = array<i32>} : memref<512x64xf32, #tpu.memory_space<vmem>>, vector<128x64xf32>,
    %c256 = arith.constant 256 : index
    %c0_21 = arith.constant 0 : index
    %28 = vector.load %arg1[%c256, %c0_21] : memref<512x32xf32, #tpu.memory_space<vmem>>, vector<128x32xf32>
    %cst_22 = arith.constant dense<0.000000e+00> : vector<128x64xf32>
    %29 = tpu.matmul %28, %0, %cst_22 {dimension_numbers = #tpu.dot_dimension_numbers<[1], [0], [0], [1], [0, 0, 1, 1], [], []>} : vector<128x32xf32>, vector<32x64xf32>, vector<128x64xf32> -> vector<128x64xf32>
    %30 = vector.broadcast %2 : vector<1x64xf32> to vector<128x64xf32>
    %31 = arith.addf %29, %30 : vector<128x64xf32>
    %cst_23 = arith.constant 0.000000e+00 : f32
    %32 = vector.broadcast %cst_23 : f32 to vector<128x64xf32>
    %33 = arith.maximumf %31, %32 : vector<128x64xf32>
    %cst_24 = arith.constant dense<0.000000e+00> : vector<128x64xf32>
    %34 = tpu.matmul %33, %1, %cst_24 {dimension_numbers = #tpu.dot_dimension_numbers<[1], [0], [0], [1], [0, 0, 1, 1], [], []>} : vector<128x64xf32>, vector<64x64xf32>, vector<128x64xf32> -> vector<128x64xf32>
    %35 = vector.broadcast %3 : vector<1x64xf32> to vector<128x64xf32>
    %36 = arith.addf %34, %35 : vector<128x64xf32>
    %cst_25 = arith.constant 0.000000e+00 : f32
    %37 = vector.broadcast %cst_25 : f32 to vector<128x64xf32>
    %38 = arith.maximumf %36, %37 : vector<128x64xf32>
    %c256_26 = arith.constant 256 : index
    %c0_27 = arith.constant 0 : index
    %39 = vector.load %arg6[%c256_26, %c0_27] : memref<512x64xf32, #tpu.memory_space<vmem>>, vector<128x64xf32>
    tpu.vector_store %arg6[%c256_26, %c0_27], %38 {strides = array<i32>} : memref<512x64xf32, #tpu.memory_space<vmem>>, vector<128x64xf32>,
    %c384 = arith.constant 384 : index
    %c0_28 = arith.constant 0 : index
    %40 = vector.load %arg1[%c384, %c0_28] : memref<512x32xf32, #tpu.memory_space<vmem>>, vector<128x32xf32>
    %cst_29 = arith.constant dense<0.000000e+00> : vector<128x64xf32>
    %41 = tpu.matmul %40, %0, %cst_29 {dimension_numbers = #tpu.dot_dimension_numbers<[1], [0], [0], [1], [0, 0, 1, 1], [], []>} : vector<128x32xf32>, vector<32x64xf32>, vector<128x64xf32> -> vector<128x64xf32>
    %42 = vector.broadcast %2 : vector<1x64xf32> to vector<128x64xf32>
    %43 = arith.addf %41, %42 : vector<128x64xf32>
    %cst_30 = arith.constant 0.000000e+00 : f32
    %44 = vector.broadcast %cst_30 : f32 to vector<128x64xf32>
    %45 = arith.maximumf %43, %44 : vector<128x64xf32>
    %cst_31 = arith.constant dense<0.000000e+00> : vector<128x64xf32>
    %46 = tpu.matmul %45, %1, %cst_31 {dimension_numbers = #tpu.dot_dimension_numbers<[1], [0], [0], [1], [0, 0, 1, 1], [], []>} : vector<128x64xf32>, vector<64x64xf32>, vector<128x64xf32> -> vector<128x64xf32>
    %47 = vector.broadcast %3 : vector<1x64xf32> to vector<128x64xf32>
    %48 = arith.addf %46, %47 : vector<128x64xf32>
    %cst_32 = arith.constant 0.000000e+00 : f32
    %49 = vector.broadcast %cst_32 : f32 to vector<128x64xf32>
    %50 = arith.maximumf %48, %49 : vector<128x64xf32>
    %c384_33 = arith.constant 384 : index
    %c0_34 = arith.constant 0 : index
    %51 = vector.load %arg6[%c384_33, %c0_34] : memref<512x64xf32, #tpu.memory_space<vmem>>, vector<128x64xf32>
    tpu.vector_store %arg6[%c384_33, %c0_34], %50 {strides = array<i32>} : memref<512x64xf32, #tpu.memory_space<vmem>>, vector<128x64xf32>,
    return
  }
  func.func @transform_0(%arg0: i32) -> (i32, i32) {
    %c0_i32 = arith.constant 0 : i32
    %c0_i32_0 = arith.constant 0 : i32
    return %arg0, %c0_i32 : i32, i32
  }
  func.func @transform_1(%arg0: i32) -> (i32, i32) {
    %c0_i32 = arith.constant 0 : i32
    %c0_i32_0 = arith.constant 0 : i32
    %c0_i32_1 = arith.constant 0 : i32
    return %c0_i32, %c0_i32_0 : i32, i32
  }
  func.func @transform_2(%arg0: i32) -> (i32, i32) {
    %c0_i32 = arith.constant 0 : i32
    %c0_i32_0 = arith.constant 0 : i32
    %c0_i32_1 = arith.constant 0 : i32
    return %c0_i32, %c0_i32_0 : i32, i32
  }
  func.func @transform_3(%arg0: i32) -> (i32, i32) {
    %c0_i32 = arith.constant 0 : i32
    %c0_i32_0 = arith.constant 0 : i32
    %c0_i32_1 = arith.constant 0 : i32
    return %c0_i32, %c0_i32_0 : i32, i32
  }
  func.func @transform_4(%arg0: i32) -> (i32, i32) {
    %c0_i32 = arith.constant 0 : i32
    %c0_i32_0 = arith.constant 0 : i32
    %c0_i32_1 = arith.constant 0 : i32
    return %c0_i32, %c0_i32_0 : i32, i32
  }
  func.func @transform_5(%arg0: i32) -> (i32, i32) {
    %c0_i32 = arith.constant 0 : i32
    %c0_i32_0 = arith.constant 0 : i32
    return %arg0, %c0_i32 : i32, i32
  }
}

</mosaic_0001>

<bundles_post_ra>
// kernel: tpu_custom_call.1
= control target key start
LH: loop header
LB: loop body
LE: loop exit
PB: predicated region body
PF: predicated region fallthrough
CT: control target
= control target key end

     0   :  { %s3385_s18 = smov 0   ;;  %s3387_s19 = smov 0   ;;  %s4263_s0 = inlined_call_operand.vmem [shape: f32[1000,32], index: 0, kind: input, shape index: {}]   ;;  %s4264_s1 = inlined_call_operand.vmem [shape: f32[32,64], index: 1, kind: input, shape index: {}]   ;;  %s4265_s2 = inlined_call_operand.vmem [shape: f32[1,64], index: 2, kind: input, shape index: {}]   ;;  %s4266_s3 = inlined_call_operand.vmem [shape: f32[64,64], index: 3, kind: input, shape index: {}]   ;;  %s4267_s4 = inlined_call_operand.vmem [shape: f32[1,64], index: 4, kind: input, shape index: {}]   ;;  %s4268_s5 = inlined_call_operand.vmem [shape: f32[1000,64], index: 5, kind: output, shape index: {}]  }
   0x1   :  { %s3389_s20 = smov 0  }
   0x2 LB: > { %s3398_s21 = sadd.s32 4294967295, %s3321_s20   ;;  %s3400_s22 = sadd.s32 1, %s3321_s20   ;;  %s3321_s20 = sphi %s3389_s20, %s4277_s20   ;;  %s3317_s19 = sphi %s3387_s19, %s4276_s19   ;;  %s3313_s18 = sphi %s3385_s18, %s4275_s18  }
   0x3   : > { %s129_s23 = ssub.s32 %s3321_s20, %s3400_s22  ;;  %s132_s24 = sadd.s32 1, %s3317_s19 }
   0x4   : > { %p130_p0 = scmp.eq.s32.totalorder %s129_s23, 0  ;;  %p142_p1 = scmp.ne.s32.totalorder %s3317_s19, %s3313_s18 }
   0x5   : > { %p143_p2 = scmp.eq.s32.totalorder %s3398_s21, 1  ;;  %p2545_p3 = scmp.ge.s32.totalorder %s3321_s20, 1 }
   0x6   : > { %s3408_s25 = scalar_select %p130_p0, %s3317_s19, %s132_s24  }
   0x7   : > { %p3410_p4 = por %p143_p2, %p142_p1  ;;  %p196_p5 = scmp.lt.s32.totalorder %s3321_s20, 3 }
   0x9   : > { %p197_p6 = pnand %p2545_p3, %p196_p5 }
   0xa   : > { %s3425_s6 = sshll.u32 (!%p197_p6), %s3398_s21, 6  ;;  %s224_s16 = sand.u32 (!%p197_p6), 1, %s3313_s18  }
   0xb   : > { %200 = sbr.rel (%p197_p6) target bundleno = 613 (0x265), region = 40  ;;  %p232_p7 = scmp.lt.s32.totalorder (!%p197_p6), %s3425_s6, 124 }
   0xc   : > { %s2546_s23 = sshll.u32 (!%p197_p6), %s224_s16, 9 }
   0xd   : > { %s3865_s24 = scalar_lea.vmem (!%p197_p6), [#allocation2], %s2546_s23  }
  0x10   : > { %v3417_v0 = vld [vmem:[%s4264_s1 + $0x18] sm:$0xff]  ;;  %v3422_v1 = vld [vmem:[%s4264_s1 + $0x10] sm:$0xff]  ;;  %v3433_v2 = vld [vmem:[%s4264_s1 + $0x8] sm:$0xff]  ;;  %s233_s9 = scalar_select %p232_p7, %s3425_s6, 124  ;;  %vm282_vm0 = vcmask 261120   ;;  %vm498_vm1 = vcmask 523264  }
  0x11   : > { %2875 = vmatprep.subr.mxu0 %v3417_v0  ;;  %v3441_v3 = vld [vmem:[%s4264_s1] sm:$0xff]  ;;  %v3447_v4 = vld [vmem:[%s4266_s3 + $0x38] sm:$0xff]  ;;  %v3466_v8 = vld [vmem:[%s4266_s3 + $0x30] sm:$0xff]  ;;  %s2082_s18 = ssub.s32 (%p3410_p4), 125, %s3425_s6  ;;  %s2696_s27 = sshll.u32 (%p3410_p4), %s3398_s21, 9 }
  0x12   : > { %2876 = vmatpush3.msra.mxu0 %v3417_v0  ;;  %s2548_s12 = sshll.u32 %s233_s9, 3  ;;  %2907 = vmatprep.subr.mxu1 %v3447_v4  ;;  %v3481_v11 = vld [vmem:[%s4266_s3 + $0x28] sm:$0xff]  ;;  %v3494_v14 = vld [vmem:[%s4266_s3 + $0x20] sm:$0xff]  ;;  %v3568_v43 = vld [vmem:[%s4266_s3 + $0x18] sm:$0xff]  ;;  %p2083_p8 = scmp.lt.s32.totalorder (%p3410_p4), %s2082_s18, 64 }
  0x13   : > { %2877 = vmatprep.subr.mxu0 %v3422_v1  ;;  %s3453_s17 = scalar_lea.vmem %s4263_s0, %s2548_s12  ;;  %2908 = vmatpush3.msra.mxu1 %v3447_v4  ;;  %v3578_v45 = vld [vmem:[%s4266_s3 + $0x10] sm:$0xff]  ;;  %v3590_v47 = vld [vmem:[%s4266_s3 + $0x8] sm:$0xff]  ;;  %v3601_v50 = vld [vmem:[%s4266_s3] sm:$0xff]  ;;  %s4064_s30 = scalar_lea.vmem (%p3410_p4), %s4268_s5, %s2696_s27  }
  0x14   : > { %2878 = vmatpush3.msra.mxu0 %v3422_v1  ;;  %v260_v5 = vld [vmem:[%s3453_s17] sm:$0xff]  ;;  %v261_v6 = vld [vmem:[%s3453_s17 + $0x8] sm:$0xff]  ;;  %v262_v7 = vld [vmem:[%s3453_s17 + $0x10] sm:$0xff]  ;;  %2909 = vmatprep.subr.mxu1 %v3466_v8 }
  0x15   : > { %2879 = vmatprep.subr.mxu0 %v3433_v2  ;;  %2883 = vmatprep.mubr.msk.f32.mxu0 %vm282_vm0, %v260_v5  ;;  %v263_v9 = vld [vmem:[%s3453_s17 + $0x18] sm:$0xff]  ;;  %v264_v10 = vld [vmem:[%s3453_s17 + $0x20] sm:$0xff]  ;;  %v265_v12 = vld [vmem:[%s3453_s17 + $0x28] sm:$0xff] }
  0x16   : > { %2880 = vmatpush3.msra.mxu0 %v3433_v2  ;;  %2910 = vmatpush3.msra.mxu1 %v3466_v8  ;;  %v266_v13 = vld [vmem:[%s3453_s17 + $0x30] sm:$0xff]  ;;  %v267_v15 = vld [vmem:[%s3453_s17 + $0x38] sm:$0xff]  ;;  %v268_v16 = vld [vmem:[%s3453_s17 + $0x40] sm:$0xff] }
  0x17   : > { %2881 = vmatprep.subr.mxu0 %v3441_v3  ;;  %2911 = vmatprep.subr.mxu1 %v3481_v11  ;;  %v269_v17 = vld [vmem:[%s3453_s17 + $0x48] sm:$0xff]  ;;  %v270_v18 = vld [vmem:[%s3453_s17 + $0x50] sm:$0xff]  ;;  %v271_v19 = vld [vmem:[%s3453_s17 + $0x58] sm:$0xff] }
  0x18   : > { %2882 = vmatpush3.msra.mxu0 %v3441_v3  ;;  %2912 = vmatpush3.msra.mxu1 %v3481_v11  ;;  %v272_v20 = vld [vmem:[%s3453_s17 + $0x60] sm:$0xff]  ;;  %v273_v21 = vld [vmem:[%s3453_s17 + $0x68] sm:$0xff]  ;;  %v274_v22 = vld [vmem:[%s3453_s17 + $0x70] sm:$0xff] }
  0x19   : > { %2884 = vmatmul.mubr.msk.f32.vlgmr.msra.gmra.mxu0 %vm282_vm0, %v261_v6  ;;  %2947 = vmatprep.subr.mxu0 %v3417_v0  ;;  %v275_v23 = vld [vmem:[%s3453_s17 + $0x78] sm:$0xff]  ;;  %v724_v24 = vld [vmem:[%s3453_s17 + $0x80] sm:$0xff]  ;;  %v725_v25 = vld [vmem:[%s3453_s17 + $0x88] sm:$0xff] }
  0x1a   : > { %2948 = vmatpush3.msra.mxu0 %v3417_v0  ;;  %2886 = vmatprep.mubr.msk.f32.mxu0 %vm282_vm0, %v262_v7  ;;  %v726_v26 = vld [vmem:[%s3453_s17 + $0x90] sm:$0xff]  ;;  %v727_v27 = vld [vmem:[%s3453_s17 + $0x98] sm:$0xff]  ;;  %v728_v28 = vld [vmem:[%s3453_s17 + $0xa0] sm:$0xff] }
  0x1b   : > { %2949 = vmatprep.subr.mxu0 %v3422_v1  ;;  %2913 = vmatprep.subr.mxu1 %v3494_v14  ;;  %v729_v29 = vld [vmem:[%s3453_s17 + $0xa8] sm:$0xff]  ;;  %v730_v30 = vld [vmem:[%s3453_s17 + $0xb0] sm:$0xff]  ;;  %v731_v31 = vld [vmem:[%s3453_s17 + $0xb8] sm:$0xff] }
  0x1c   : > { %2950 = vmatpush3.msra.mxu0 %v3422_v1  ;;  %2914 = vmatpush3.msra.mxu1 %v3494_v14  ;;  %v732_v32 = vld [vmem:[%s3453_s17 + $0xc0] sm:$0xff]  ;;  %v733_v33 = vld [vmem:[%s3453_s17 + $0xc8] sm:$0xff]  ;;  %v734_v34 = vld [vmem:[%s3453_s17 + $0xd0] sm:$0xff] }
  0x1d   : > { %2887 = vmatmul.mubr.msk.f32.gmra.mxu0 %vm282_vm0, %v263_v9  ;;  %2951 = vmatprep.subr.mxu0 %v3433_v2  ;;  %v735_v35 = vld [vmem:[%s3453_s17 + $0xd8] sm:$0xff]  ;;  %v736_v36 = vld [vmem:[%s3453_s17 + $0xe0] sm:$0xff]  ;;  %v737_v37 = vld [vmem:[%s3453_s17 + $0xe8] sm:$0xff] }
  0x1e   : > { %2889 = vmatprep.mubr.msk.f32.mxu0 %vm282_vm0, %v264_v10  ;;  %2952 = vmatpush3.msra.mxu0 %v3433_v2  ;;  %v738_v38 = vld [vmem:[%s3453_s17 + $0xf0] sm:$0xff]  ;;  %v739_v39 = vld [vmem:[%s3453_s17 + $0xf8] sm:$0xff]  ;;  %v1174_v40 = vld [vmem:[%s3453_s17 + $0x100] sm:$0xff] }
  0x1f   : > { %2953 = vmatprep.subr.mxu0 %v3441_v3  ;;  %v1175_v41 = vld [vmem:[%s3453_s17 + $0x108] sm:$0xff]  ;;  %v1176_v42 = vld [vmem:[%s3453_s17 + $0x110] sm:$0xff]  ;;  %2915 = vmatprep.subr.mxu1 %v3568_v43  ;;  %v1177_v44 = vld [vmem:[%s3453_s17 + $0x118] sm:$0xff] }
  0x20   : > { %2954 = vmatpush3.msra.mxu0 %v3441_v3  ;;  %v1178_v46 = vld [vmem:[%s3453_s17 + $0x120] sm:$0xff]  ;;  %2916 = vmatpush3.msra.mxu1 %v3568_v43  ;;  %v1179_v48 = vld [vmem:[%s3453_s17 + $0x128] sm:$0xff]  ;;  %v1180_v49 = vld [vmem:[%s3453_s17 + $0x130] sm:$0xff] }
  0x21   : > { %2890 = vmatmul.mubr.msk.f32.gmra.mxu0 %vm282_vm0, %v265_v12  ;;  %3019 = vmatprep.subr.mxu0 %v3417_v0  ;;  %v1181_v51 = vld [vmem:[%s3453_s17 + $0x138] sm:$0xff]  ;;  %v1182_v52 = vld [vmem:[%s3453_s17 + $0x140] sm:$0xff]  ;;  %v1183_v53 = vld [vmem:[%s3453_s17 + $0x148] sm:$0xff] }
  0x22   : > { %2892 = vmatprep.mubr.msk.f32.mxu0 %vm282_vm0, %v266_v13  ;;  %2917 = vmatprep.subr.mxu1 %v3578_v45  ;;  %v1184_v54 = vld [vmem:[%s3453_s17 + $0x150] sm:$0xff]  ;;  %v1185_v55 = vld [vmem:[%s3453_s17 + $0x158] sm:$0xff]  ;;  %v1186_v56 = vld [vmem:[%s3453_s17 + $0x160] sm:$0xff] }
  0x23   : > { %2918 = vmatpush3.msra.mxu1 %v3578_v45  ;;  %v1187_v57 = vld [vmem:[%s3453_s17 + $0x168] sm:$0xff]  ;;  %v1188_v58 = vld [vmem:[%s3453_s17 + $0x170] sm:$0xff]  ;;  %v1189_v59 = vld [vmem:[%s3453_s17 + $0x178] sm:$0xff] }
  0x24   : > { %2919 = vmatprep.subr.mxu1 %v3590_v47  ;;  %v1624_v60 = vld [vmem:[%s3453_s17 + $0x180] sm:$0xff]  ;;  %v1625_v61 = vld [vmem:[%s3453_s17 + $0x188] sm:$0xff]  ;;  %v1626_v62 = vld [vmem:[%s3453_s17 + $0x190] sm:$0xff] }
  0x25   : > { %2893 = vmatmul.mubr.msk.f32.gmra.mxu0 %vm282_vm0, %v267_v15  ;;  %2920 = vmatpush3.msra.mxu1 %v3590_v47  ;;  %v1627_v63 = vld [vmem:[%s3453_s17 + $0x198] sm:$0xff]  ;;  %v1632_v5 = vld [vmem:[%s3453_s17 + $0x1c0] sm:$0xff]  ;;  %v1633_v6 = vld [vmem:[%s3453_s17 + $0x1c8] sm:$0xff] }
  0x26   : > { %2895 = vmatprep.mubr.msk.f32.mxu0 %vm282_vm0, %v268_v16  ;;  %2921 = vmatprep.subr.mxu1 %v3601_v50  ;;  %v1634_v7 = vld [vmem:[%s3453_s17 + $0x1d0] sm:$0xff]  ;;  %v1635_v9 = vld [vmem:[%s3453_s17 + $0x1d8] sm:$0xff]  ;;  %v1636_v10 = vld [vmem:[%s3453_s17 + $0x1e0] sm:$0xff] }
  0x27   : > { %2922 = vmatpush3.msra.mxu1 %v3601_v50  ;;  %v1637_v12 = vld [vmem:[%s3453_s17 + $0x1e8] sm:$0xff]  ;;  %v1638_v13 = vld [vmem:[%s3453_s17 + $0x1f0] sm:$0xff]  ;;  %v1639_v15 = vld [vmem:[%s3453_s17 + $0x1f8] sm:$0xff] }
  0x28   : > { %2979 = vmatprep.subr.mxu1 %v3447_v4  ;;  %v3680_v16 = vld [vmem:[%s4265_s2] ss:$0 sm:$0xff] }
  0x29   : > { %2896 = vmatmul.mubr.msk.f32.gmra.mxu0 %vm282_vm0, %v269_v17 }
  0x2a   : > { %2898 = vmatprep.mubr.msk.f32.mxu0 %vm282_vm0, %v270_v18 }
  0x2d   : > { %2899 = vmatmul.mubr.msk.f32.gmra.mxu0 %vm282_vm0, %v271_v19 }
  0x2e   : > { %2901 = vmatprep.mubr.msk.f32.mxu0 %vm282_vm0, %v272_v20 }
  0x31   : > { %2902 = vmatmul.mubr.msk.f32.gmra.mxu0 %vm282_vm0, %v273_v21 }
  0x32   : > { %2904 = vmatprep.mubr.msk.f32.mxu0 %vm282_vm0, %v274_v22 }
  0x35   : > { %2905 = vmatmul.mubr.msk.f32.gmra.mxu0 %vm282_vm0, %v275_v23 }
  0x36   : > { %2955 = vmatprep.mubr.msk.f32.mxu0 %vm282_vm0, %v724_v24 }
  0x39   : > { %2956 = vmatmul.mubr.msk.f32.vlgmr.msra.gmra.mxu0 %vm282_vm0, %v725_v25 }
  0x3a   : > { %3020 = vmatpush3.msra.mxu0 %v3417_v0  ;;  %2958 = vmatprep.mubr.msk.f32.mxu0 %vm282_vm0, %v726_v26 }
  0x3b   : > { %3021 = vmatprep.subr.mxu0 %v3422_v1 }
  0x3c   : > { %3022 = vmatpush3.msra.mxu0 %v3422_v1 }
  0x3d   : > { %2959 = vmatmul.mubr.msk.f32.gmra.mxu0 %vm282_vm0, %v727_v27  ;;  %3023 = vmatprep.subr.mxu0 %v3433_v2 }
  0x3e   : > { %2961 = vmatprep.mubr.msk.f32.mxu0 %vm282_vm0, %v728_v28  ;;  %3024 = vmatpush3.msra.mxu0 %v3433_v2 }
  0x3f   : > { %3025 = vmatprep.subr.mxu0 %v3441_v3 }
  0x40   : > { %3026 = vmatpush3.msra.mxu0 %v3441_v3 }
  0x41   : > { %2962 = vmatmul.mubr.msk.f32.gmra.mxu0 %vm282_vm0, %v729_v29  ;;  %3091 = vmatprep.subr.mxu0 %v3417_v0 }
  0x42   : > { %2964 = vmatprep.mubr.msk.f32.mxu0 %vm282_vm0, %v730_v30 }
  0x45   : > { %2965 = vmatmul.mubr.msk.f32.gmra.mxu0 %vm282_vm0, %v731_v31 }
  0x46   : > { %2967 = vmatprep.mubr.msk.f32.mxu0 %vm282_vm0, %v732_v32 }
  0x49   : > { %2968 = vmatmul.mubr.msk.f32.gmra.mxu0 %vm282_vm0, %v733_v33 }
  0x4a   : > { %2970 = vmatprep.mubr.msk.f32.mxu0 %vm282_vm0, %v734_v34 }
  0x4d   : > { %2971 = vmatmul.mubr.msk.f32.gmra.mxu0 %vm282_vm0, %v735_v35 }
  0x4e   : > { %2973 = vmatprep.mubr.msk.f32.mxu0 %vm282_vm0, %v736_v36 }
  0x51   : > { %2974 = vmatmul.mubr.msk.f32.gmra.mxu0 %vm282_vm0, %v737_v37 }
  0x52   : > { %2976 = vmatprep.mubr.msk.f32.mxu0 %vm282_vm0, %v738_v38 }
  0x55   : > { %2977 = vmatmul.mubr.msk.f32.gmra.mxu0 %vm282_vm0, %v739_v39 }
  0x56   : > { %3027 = vmatprep.mubr.msk.f32.mxu0 %vm282_vm0, %v1174_v40 }
  0x59   : > { %3028 = vmatmul.mubr.msk.f32.vlgmr.msra.gmra.mxu0 %vm282_vm0, %v1175_v41 }
  0x5a   : > { %3092 = vmatpush3.msra.mxu0 %v3417_v0  ;;  %3030 = vmatprep.mubr.msk.f32.mxu0 %vm282_vm0, %v1176_v42  ;;  %v1628_v0 = vld [vmem:[%s3453_s17 + $0x1a0] sm:$0xff] }
  0x5b   : > { %3093 = vmatprep.subr.mxu0 %v3422_v1 }
  0x5c   : > { %3094 = vmatpush3.msra.mxu0 %v3422_v1  ;;  %v1629_v1 = vld [vmem:[%s3453_s17 + $0x1a8] sm:$0xff] }
  0x5d   : > { %3031 = vmatmul.mubr.msk.f32.gmra.mxu0 %vm282_vm0, %v1177_v44  ;;  %3095 = vmatprep.subr.mxu0 %v3433_v2 }
  0x5e   : > { %3033 = vmatprep.mubr.msk.f32.mxu0 %vm282_vm0, %v1178_v46  ;;  %3096 = vmatpush3.msra.mxu0 %v3433_v2  ;;  %v1630_v2 = vld [vmem:[%s3453_s17 + $0x1b0] sm:$0xff] }
  0x5f   : > { %3097 = vmatprep.subr.mxu0 %v3441_v3 }
  0x60   : > { %3098 = vmatpush3.msra.mxu0 %v3441_v3  ;;  %v1631_v3 = vld [vmem:[%s3453_s17 + $0x1b8] sm:$0xff] }
  0x61   : > { %3034 = vmatmul.mubr.msk.f32.gmra.mxu0 %vm282_vm0, %v1179_v48  ;;  %3123 = vmatprep.subr.mxu0 %v3447_v4 }
  0x62   : > { %3036 = vmatprep.mubr.msk.f32.mxu0 %vm282_vm0, %v1180_v49 }
  0x65   : > { %3037 = vmatmul.mubr.msk.f32.gmra.mxu0 %vm282_vm0, %v1181_v51 }
  0x66   : > { %3039 = vmatprep.mubr.msk.f32.mxu0 %vm282_vm0, %v1182_v52 }
  0x69   : > { %3040 = vmatmul.mubr.msk.f32.gmra.mxu0 %vm282_vm0, %v1183_v53 }
  0x6a   : > { %3042 = vmatprep.mubr.msk.f32.mxu0 %vm282_vm0, %v1184_v54 }
  0x6d   : > { %3043 = vmatmul.mubr.msk.f32.gmra.mxu0 %vm282_vm0, %v1185_v55 }
  0x6e   : > { %3045 = vmatprep.mubr.msk.f32.mxu0 %vm282_vm0, %v1186_v56 }
  0x71   : > { %3046 = vmatmul.mubr.msk.f32.gmra.mxu0 %vm282_vm0, %v1187_v57 }
  0x72   : > { %3048 = vmatprep.mubr.msk.f32.mxu0 %vm282_vm0, %v1188_v58 }
  0x75   : > { %3049 = vmatmul.mubr.msk.f32.gmra.mxu0 %vm282_vm0, %v1189_v59 }
  0x76   : > { %3099 = vmatprep.mubr.msk.f32.mxu0 %vm282_vm0, %v1624_v60 }
  0x79   : > { %3100 = vmatmul.mubr.msk.f32.vlgmr.msra.gmra.mxu0 %vm282_vm0, %v1625_v61 }
  0x7a   : > { %3102 = vmatprep.mubr.msk.f32.mxu0 %vm282_vm0, %v1626_v62  ;;  %3124 = vmatpush3.msra.mxu0 %v3447_v4 }
  0x7b   : > { %3125 = vmatprep.subr.mxu0 %v3466_v8 }
  0x7c   : > { %3126 = vmatpush3.msra.mxu0 %v3466_v8 }
  0x7d   : > { %3103 = vmatmul.mubr.msk.f32.gmra.mxu0 %vm282_vm0, %v1627_v63  ;;  %3127 = vmatprep.subr.mxu0 %v3481_v11 }
  0x7e   : > { %3105 = vmatprep.mubr.msk.f32.mxu0 %vm282_vm0, %v1628_v0  ;;  %3128 = vmatpush3.msra.mxu0 %v3481_v11 }
  0x7f   : > { %3129 = vmatprep.subr.mxu0 %v3494_v14 }
  0x80   : > { %3130 = vmatpush3.msra.mxu0 %v3494_v14 }
  0x81   : > { %3106 = vmatmul.mubr.msk.f32.gmra.mxu0 %vm282_vm0, %v1629_v1  ;;  %3131 = vmatprep.subr.mxu0 %v3568_v43 }
  0x82   : > { %3108 = vmatprep.mubr.msk.f32.mxu0 %vm282_vm0, %v1630_v2  ;;  %3132 = vmatpush3.msra.mxu0 %v3568_v43 }
  0x83   : > { %3133 = vmatprep.subr.mxu0 %v3578_v45 }
  0x84   : > { %3134 = vmatpush3.msra.mxu0 %v3578_v45 }
  0x85   : > { %3109 = vmatmul.mubr.msk.f32.gmra.mxu0 %vm282_vm0, %v1631_v3  ;;  %3135 = vmatprep.subr.mxu0 %v3590_v47 }
  0x86   : > { %3111 = vmatprep.mubr.msk.f32.mxu0 %vm282_vm0, %v1632_v5  ;;  %3136 = vmatpush3.msra.mxu0 %v3590_v47 }
  0x87   : > { %3137 = vmatprep.subr.mxu0 %v3601_v50 }
  0x88   : > { %3138 = vmatpush3.msra.mxu0 %v3601_v50 }
  0x89   : > { %3112 = vmatmul.mubr.msk.f32.gmra.mxu0 %vm282_vm0, %v1633_v6 }
  0x8a   : > { %3114 = vmatprep.mubr.msk.f32.mxu0 %vm282_vm0, %v1634_v7 }
  0x8d   : > { %3115 = vmatmul.mubr.msk.f32.gmra.mxu0 %vm282_vm0, %v1635_v9 }
  0x8e   : > { %3117 = vmatprep.mubr.msk.f32.mxu0 %vm282_vm0, %v1636_v10 }
  0x91   : > { %3118 = vmatmul.mubr.msk.f32.gmra.mxu0 %vm282_vm0, %v1637_v12 }
  0x92   : > { %3120 = vmatprep.mubr.msk.f32.mxu0 %vm282_vm0, %v1638_v13 }
  0x95   : > { %3121 = vmatmul.mubr.msk.f32.gmra.mxu0 %vm282_vm0, %v1639_v15 }
  0xd9   : > { %v2885_v17 = vpop.f32.mrf.mxu0 }
  0xda   : > { %v403_v18 = vadd.f32 %v2885_v17, %v3680_v16 }
  0xdb   : > { %v397_v19 = vpop.f32.mrf.mxu0 }
  0xdc   : > { %v398_v20 = vadd.f32 %v3680_v16, %v397_v19  ;;  %v477_v23 = vmax.f32 %v403_v18, 0.0 }
  0xdd   : > { %v2888_v21 = vpop.f32.mrf.mxu0 }
  0xde   : > { %v476_v22 = vmax.f32 %v398_v20, 0.0  ;;  %v413_v24 = vadd.f32 %v2888_v21, %v3680_v16 }
  0xdf   : > { %v407_v25 = vpop.f32.mrf.mxu0 }
  0xe0   : > { %v408_v26 = vadd.f32 %v3680_v16, %v407_v25  ;;  %2923 = vmatprep.mubr.msk.f32.mxu1 %vm498_vm1, %v476_v22  ;;  %v479_v29 = vmax.f32 %v413_v24, 0.0 }
  0xe1   : > { %v2891_v27 = vpop.f32.mrf.mxu0  ;;  %2924 = vmatmul.mubr.msk.f32.vlgmr.msra.gmra.mxu1 %vm498_vm1, %v477_v23 }
  0xe2   : > { %v478_v28 = vmax.f32 %v408_v26, 0.0  ;;  %2980 = vmatpush3.msra.mxu1 %v3447_v4  ;;  %v423_v30 = vadd.f32 %v2891_v27, %v3680_v16 }
  0xe3   : > { %v417_v31 = vpop.f32.mrf.mxu0  ;;  %2981 = vmatprep.subr.mxu1 %v3466_v8 }
  0xe4   : > { %v418_v32 = vadd.f32 %v3680_v16, %v417_v31  ;;  %2926 = vmatprep.mubr.msk.f32.mxu1 %vm498_vm1, %v478_v28  ;;  %2982 = vmatpush3.msra.mxu1 %v3466_v8  ;;  %v481_v35 = vmax.f32 %v423_v30, 0.0 }
  0xe5   : > { %v2894_v33 = vpop.f32.mrf.mxu0  ;;  %2927 = vmatmul.mubr.msk.f32.gmra.mxu1 %vm498_vm1, %v479_v29  ;;  %2983 = vmatprep.subr.mxu1 %v3481_v11 }
  0xe6   : > { %v480_v34 = vmax.f32 %v418_v32, 0.0  ;;  %2984 = vmatpush3.msra.mxu1 %v3481_v11  ;;  %v433_v36 = vadd.f32 %v2894_v33, %v3680_v16 }
  0xe7   : > { %v427_v37 = vpop.f32.mrf.mxu0  ;;  %2985 = vmatprep.subr.mxu1 %v3494_v14 }
  0xe8   : > { %v428_v38 = vadd.f32 %v3680_v16, %v427_v37  ;;  %2929 = vmatprep.mubr.msk.f32.mxu1 %vm498_vm1, %v480_v34  ;;  %2986 = vmatpush3.msra.mxu1 %v3494_v14  ;;  %v483_v41 = vmax.f32 %v433_v36, 0.0 }
  0xe9   : > { %v2897_v39 = vpop.f32.mrf.mxu0  ;;  %2930 = vmatmul.mubr.msk.f32.gmra.mxu1 %vm498_vm1, %v481_v35  ;;  %2987 = vmatprep.subr.mxu1 %v3568_v43 }
  0xea   : > { %v482_v40 = vmax.f32 %v428_v38, 0.0  ;;  %2988 = vmatpush3.msra.mxu1 %v3568_v43  ;;  %v443_v42 = vadd.f32 %v2897_v39, %v3680_v16 }
  0xeb   : > { %v437_v44 = vpop.f32.mrf.mxu0  ;;  %2989 = vmatprep.subr.mxu1 %v3578_v45 }
  0xec   : > { %v438_v46 = vadd.f32 %v3680_v16, %v437_v44  ;;  %2932 = vmatprep.mubr.msk.f32.mxu1 %vm498_vm1, %v482_v40  ;;  %2990 = vmatpush3.msra.mxu1 %v3578_v45  ;;  %v485_v51 = vmax.f32 %v443_v42, 0.0 }
  0xed   : > { %v2900_v48 = vpop.f32.mrf.mxu0  ;;  %2933 = vmatmul.mubr.msk.f32.gmra.mxu1 %vm498_vm1, %v483_v41  ;;  %2991 = vmatprep.subr.mxu1 %v3590_v47 }
  0xee   : > { %v484_v49 = vmax.f32 %v438_v46, 0.0  ;;  %2992 = vmatpush3.msra.mxu1 %v3590_v47  ;;  %v453_v52 = vadd.f32 %v2900_v48, %v3680_v16 }
  0xef   : > { %v447_v53 = vpop.f32.mrf.mxu0  ;;  %2993 = vmatprep.subr.mxu1 %v3601_v50 }
  0xf0   : > { %v448_v54 = vadd.f32 %v3680_v16, %v447_v53  ;;  %2935 = vmatprep.mubr.msk.f32.mxu1 %vm498_vm1, %v484_v49  ;;  %2994 = vmatpush3.msra.mxu1 %v3601_v50  ;;  %v487_v57 = vmax.f32 %v453_v52, 0.0 }
  0xf1   : > { %v2903_v55 = vpop.f32.mrf.mxu0  ;;  %2936 = vmatmul.mubr.msk.f32.gmra.mxu1 %vm498_vm1, %v485_v51  ;;  %3051 = vmatprep.subr.mxu1 %v3447_v4 }
  0xf2   : > { %v486_v56 = vmax.f32 %v448_v54, 0.0  ;;  %v463_v58 = vadd.f32 %v2903_v55, %v3680_v16 }
  0xf3   : > { %v457_v59 = vpop.f32.mrf.mxu0 }
  0xf4   : > { %v458_v60 = vadd.f32 %v3680_v16, %v457_v59  ;;  %2938 = vmatprep.mubr.msk.f32.mxu1 %vm498_vm1, %v486_v56  ;;  %v489_v63 = vmax.f32 %v463_v58, 0.0 }
  0xf5   : > { %v2906_v61 = vpop.f32.mrf.mxu0  ;;  %2939 = vmatmul.mubr.msk.f32.gmra.mxu1 %vm498_vm1, %v487_v57 }
  0xf6   : > { %v488_v62 = vmax.f32 %v458_v60, 0.0  ;;  %v473_v0 = vadd.f32 %v2906_v61, %v3680_v16 }
  0xf7   : > { %v467_v1 = vpop.f32.mrf.mxu0 }
  0xf8   : > { %v468_v2 = vadd.f32 %v3680_v16, %v467_v1  ;;  %2941 = vmatprep.mubr.msk.f32.mxu1 %vm498_vm1, %v488_v62  ;;  %v491_v6 = vmax.f32 %v473_v0, 0.0 }
  0xf9   : > { %2942 = vmatmul.mubr.msk.f32.gmra.mxu1 %vm498_vm1, %v489_v63  ;;  %v2957_v3 = vpop.f32.mrf.mxu0 }
  0xfa   : > { %v490_v5 = vmax.f32 %v468_v2, 0.0  ;;  %v860_v7 = vadd.f32 %v2957_v3, %v3680_v16 }
  0xfb   : > { %v854_v9 = vpop.f32.mrf.mxu0 }
  0xfc   : > { %v855_v10 = vadd.f32 %v3680_v16, %v854_v9  ;;  %2944 = vmatprep.mubr.msk.f32.mxu1 %vm498_vm1, %v490_v5  ;;  %v934_v15 = vmax.f32 %v860_v7, 0.0 }
  0xfd   : > { %2945 = vmatmul.mubr.msk.f32.gmra.mxu1 %vm498_vm1, %v491_v6  ;;  %v2960_v12 = vpop.f32.mrf.mxu0 }
  0xfe   : > { %v933_v13 = vmax.f32 %v855_v10, 0.0  ;;  %v870_v17 = vadd.f32 %v2960_v12, %v3680_v16 }
  0xff   : > { %v864_v18 = vpop.f32.mrf.mxu0 }
 0x100   : > { %v865_v19 = vadd.f32 %v3680_v16, %v864_v18  ;;  %2995 = vmatprep.mubr.msk.f32.mxu1 %vm498_vm1, %v933_v13  ;;  %v936_v22 = vmax.f32 %v870_v17, 0.0 }
 0x101   : > { %v2963_v20 = vpop.f32.mrf.mxu0  ;;  %2996 = vmatmul.mubr.msk.f32.vlgmr.msra.gmra.mxu1 %vm498_vm1, %v934_v15 }
 0x102   : > { %v935_v21 = vmax.f32 %v865_v19, 0.0  ;;  %3052 = vmatpush3.msra.mxu1 %v3447_v4  ;;  %v880_v23 = vadd.f32 %v2963_v20, %v3680_v16 }
 0x103   : > { %v874_v24 = vpop.f32.mrf.mxu0  ;;  %3053 = vmatprep.subr.mxu1 %v3466_v8 }
 0x104   : > { %v875_v25 = vadd.f32 %v3680_v16, %v874_v24  ;;  %2998 = vmatprep.mubr.msk.f32.mxu1 %vm498_vm1, %v935_v21  ;;  %3054 = vmatpush3.msra.mxu1 %v3466_v8  ;;  %v938_v28 = vmax.f32 %v880_v23, 0.0 }
 0x105   : > { %v2966_v26 = vpop.f32.mrf.mxu0  ;;  %2999 = vmatmul.mubr.msk.f32.gmra.mxu1 %vm498_vm1, %v936_v22  ;;  %3055 = vmatprep.subr.mxu1 %v3481_v11 }
 0x106   : > { %v937_v27 = vmax.f32 %v875_v25, 0.0  ;;  %3056 = vmatpush3.msra.mxu1 %v3481_v11  ;;  %v890_v29 = vadd.f32 %v2966_v26, %v3680_v16 }
 0x107   : > { %v884_v30 = vpop.f32.mrf.mxu0  ;;  %3057 = vmatprep.subr.mxu1 %v3494_v14 }
 0x108   : > { %v885_v31 = vadd.f32 %v3680_v16, %v884_v30  ;;  %3001 = vmatprep.mubr.msk.f32.mxu1 %vm498_vm1, %v937_v27  ;;  %3058 = vmatpush3.msra.mxu1 %v3494_v14  ;;  %v940_v34 = vmax.f32 %v890_v29, 0.0 }
 0x109   : > { %v2969_v32 = vpop.f32.mrf.mxu0  ;;  %3002 = vmatmul.mubr.msk.f32.gmra.mxu1 %vm498_vm1, %v938_v28  ;;  %3059 = vmatprep.subr.mxu1 %v3568_v43 }
 0x10a   : > { %v939_v33 = vmax.f32 %v885_v31, 0.0  ;;  %3060 = vmatpush3.msra.mxu1 %v3568_v43  ;;  %v900_v35 = vadd.f32 %v2969_v32, %v3680_v16 }
 0x10b   : > { %v894_v36 = vpop.f32.mrf.mxu0  ;;  %3061 = vmatprep.subr.mxu1 %v3578_v45 }
 0x10c   : > { %v895_v37 = vadd.f32 %v3680_v16, %v894_v36  ;;  %3004 = vmatprep.mubr.msk.f32.mxu1 %vm498_vm1, %v939_v33  ;;  %3062 = vmatpush3.msra.mxu1 %v3578_v45  ;;  %v942_v40 = vmax.f32 %v900_v35, 0.0 }
 0x10d   : > { %v2972_v38 = vpop.f32.mrf.mxu0  ;;  %3005 = vmatmul.mubr.msk.f32.gmra.mxu1 %vm498_vm1, %v940_v34  ;;  %3063 = vmatprep.subr.mxu1 %v3590_v47 }
 0x10e   : > { %v941_v39 = vmax.f32 %v895_v37, 0.0  ;;  %3064 = vmatpush3.msra.mxu1 %v3590_v47  ;;  %v910_v41 = vadd.f32 %v2972_v38, %v3680_v16 }
 0x10f   : > { %v904_v42 = vpop.f32.mrf.mxu0  ;;  %3065 = vmatprep.subr.mxu1 %v3601_v50 }
 0x110   : > { %v905_v44 = vadd.f32 %v3680_v16, %v904_v42  ;;  %3007 = vmatprep.mubr.msk.f32.mxu1 %vm498_vm1, %v941_v39  ;;  %3066 = vmatpush3.msra.mxu1 %v3601_v50  ;;  %v944_v49 = vmax.f32 %v910_v41, 0.0 }
 0x111   : > { %v2975_v46 = vpop.f32.mrf.mxu0  ;;  %3008 = vmatmul.mubr.msk.f32.gmra.mxu1 %vm498_vm1, %v942_v40  ;;  %3163 = vmatprep.subr.mxu1 %v3447_v4 }
 0x112   : > { %v943_v48 = vmax.f32 %v905_v44, 0.0  ;;  %v920_v51 = vadd.f32 %v2975_v46, %v3680_v16 }
 0x113   : > { %v914_v52 = vpop.f32.mrf.mxu0 }
 0x114   : > { %v915_v53 = vadd.f32 %v3680_v16, %v914_v52  ;;  %3010 = vmatprep.mubr.msk.f32.mxu1 %vm498_vm1, %v943_v48  ;;  %v946_v56 = vmax.f32 %v920_v51, 0.0 }
 0x115   : > { %v2978_v54 = vpop.f32.mrf.mxu0  ;;  %3011 = vmatmul.mubr.msk.f32.gmra.mxu1 %vm498_vm1, %v944_v49 }
 0x116   : > { %v945_v55 = vmax.f32 %v915_v53, 0.0  ;;  %v930_v57 = vadd.f32 %v2978_v54, %v3680_v16 }
 0x117   : > { %v924_v58 = vpop.f32.mrf.mxu0 }
 0x118   : > { %v925_v59 = vadd.f32 %v3680_v16, %v924_v58  ;;  %3013 = vmatprep.mubr.msk.f32.mxu1 %vm498_vm1, %v945_v55  ;;  %v948_v62 = vmax.f32 %v930_v57, 0.0 }
 0x119   : > { %3014 = vmatmul.mubr.msk.f32.gmra.mxu1 %vm498_vm1, %v946_v56  ;;  %v3029_v60 = vpop.f32.mrf.mxu0 }
 0x11a   : > { %v947_v61 = vmax.f32 %v925_v59, 0.0  ;;  %v1310_v63 = vadd.f32 %v3029_v60, %v3680_v16 }
 0x11b   : > { %v1304_v0 = vpop.f32.mrf.mxu0 }
 0x11c   : > { %v1305_v1 = vadd.f32 %v3680_v16, %v1304_v0  ;;  %3016 = vmatprep.mubr.msk.f32.mxu1 %vm498_vm1, %v947_v61  ;;  %v1384_v5 = vmax.f32 %v1310_v63, 0.0 }
 0x11d   : > { %3017 = vmatmul.mubr.msk.f32.gmra.mxu1 %vm498_vm1, %v948_v62  ;;  %v3032_v2 = vpop.f32.mrf.mxu0 }
 0x11e   : > { %v1383_v3 = vmax.f32 %v1305_v1, 0.0  ;;  %v1320_v6 = vadd.f32 %v3032_v2, %v3680_v16 }
 0x11f   : > { %v1314_v7 = vpop.f32.mrf.mxu0 }
 0x120   : > { %v1315_v9 = vadd.f32 %v3680_v16, %v1314_v7  ;;  %3067 = vmatprep.mubr.msk.f32.mxu1 %vm498_vm1, %v1383_v3  ;;  %v1386_v13 = vmax.f32 %v1320_v6, 0.0 }
 0x121   : > { %v3035_v10 = vpop.f32.mrf.mxu0  ;;  %3068 = vmatmul.mubr.msk.f32.vlgmr.msra.gmra.mxu1 %vm498_vm1, %v1384_v5 }
 0x122   : > { %v1385_v12 = vmax.f32 %v1315_v9, 0.0  ;;  %3171 = vmatpush3.msra.mxu1 %v3447_v4  ;;  %v1330_v15 = vadd.f32 %v3035_v10, %v3680_v16 }
 0x123   : > { %v1324_v17 = vpop.f32.mrf.mxu0  ;;  %3164 = vmatprep.subr.mxu1 %v3466_v8 }
 0x124   : > { %v1325_v18 = vadd.f32 %v3680_v16, %v1324_v17  ;;  %3070 = vmatprep.mubr.msk.f32.mxu1 %vm498_vm1, %v1385_v12  ;;  %3172 = vmatpush3.msra.mxu1 %v3466_v8  ;;  %v1388_v4 = vmax.f32 %v1330_v15, 0.0 }
 0x125   : > { %v3038_v19 = vpop.f32.mrf.mxu0  ;;  %3071 = vmatmul.mubr.msk.f32.gmra.mxu1 %vm498_vm1, %v1386_v13  ;;  %3165 = vmatprep.subr.mxu1 %v3481_v11 }
 0x126   : > { %v1387_v20 = vmax.f32 %v1325_v18, 0.0  ;;  %3173 = vmatpush3.msra.mxu1 %v3481_v11  ;;  %v1340_v21 = vadd.f32 %v3038_v19, %v3680_v16 }
 0x127   : > { %v1334_v22 = vpop.f32.mrf.mxu0  ;;  %3166 = vmatprep.subr.mxu1 %v3494_v14 }
 0x128   : > { %v1335_v23 = vadd.f32 %v3680_v16, %v1334_v22  ;;  %3073 = vmatprep.mubr.msk.f32.mxu1 %vm498_vm1, %v1387_v20  ;;  %3174 = vmatpush3.msra.mxu1 %v3494_v14  ;;  %v1390_v11 = vmax.f32 %v1340_v21, 0.0 }
 0x129   : > { %v3041_v8 = vpop.f32.mrf.mxu0  ;;  %3074 = vmatmul.mubr.msk.f32.gmra.mxu1 %vm498_vm1, %v1388_v4  ;;  %3167 = vmatprep.subr.mxu1 %v3568_v43 }
 0x12a   : > { %v1389_v24 = vmax.f32 %v1335_v23, 0.0  ;;  %3175 = vmatpush3.msra.mxu1 %v3568_v43  ;;  %v1350_v25 = vadd.f32 %v3041_v8, %v3680_v16 }
 0x12b   : > { %v1344_v26 = vpop.f32.mrf.mxu0  ;;  %3168 = vmatprep.subr.mxu1 %v3578_v45 }
 0x12c   : > { %v1345_v27 = vadd.f32 %v3680_v16, %v1344_v26  ;;  %3076 = vmatprep.mubr.msk.f32.mxu1 %vm498_vm1, %v1389_v24  ;;  %3176 = vmatpush3.msra.mxu1 %v3578_v45  ;;  %v1392_v43 = vmax.f32 %v1350_v25, 0.0 }
 0x12d   : > { %v3044_v14 = vpop.f32.mrf.mxu0  ;;  %3077 = vmatmul.mubr.msk.f32.gmra.mxu1 %vm498_vm1, %v1390_v11  ;;  %3169 = vmatprep.subr.mxu1 %v3590_v47 }
 0x12e   : > { %v1391_v28 = vmax.f32 %v1345_v27, 0.0  ;;  %3177 = vmatpush3.msra.mxu1 %v3590_v47  ;;  %v1360_v29 = vadd.f32 %v3044_v14, %v3680_v16 }
 0x12f   : > { %v1354_v30 = vpop.f32.mrf.mxu0  ;;  %3170 = vmatprep.subr.mxu1 %v3601_v50 }
 0x130   : > { %v1355_v31 = vadd.f32 %v3680_v16, %v1354_v30  ;;  %3079 = vmatprep.mubr.msk.f32.mxu1 %vm498_vm1, %v1391_v28  ;;  %3178 = vmatpush3.msra.mxu1 %v3601_v50  ;;  %v1394_v33 = vmax.f32 %v1360_v29, 0.0 }
 0x131   : > { %v3047_v45 = vpop.f32.mrf.mxu0  ;;  %3080 = vmatmul.mubr.msk.f32.gmra.mxu1 %vm498_vm1, %v1392_v43 }
 0x132   : > { %v1393_v32 = vmax.f32 %v1355_v31, 0.0  ;;  %v1370_v34 = vadd.f32 %v3047_v45, %v3680_v16  ;;  %v3861_v31 = vld [vmem:[%s4267_s4] ss:$0 sm:$0xff] }
 0x133   : > { %v1364_v47 = vpop.f32.mrf.mxu0 }
 0x134   : > { %v1365_v35 = vadd.f32 %v3680_v16, %v1364_v47  ;;  %3082 = vmatprep.mubr.msk.f32.mxu1 %vm498_vm1, %v1393_v32  ;;  %v1396_v38 = vmax.f32 %v1370_v34, 0.0 }
 0x135   : > { %v3050_v36 = vpop.f32.mrf.mxu0  ;;  %3083 = vmatmul.mubr.msk.f32.gmra.mxu1 %vm498_vm1, %v1394_v33 }
 0x136   : > { %v1395_v37 = vmax.f32 %v1365_v35, 0.0  ;;  %v1380_v39 = vadd.f32 %v3050_v36, %v3680_v16 }
 0x137   : > { %v1374_v50 = vpop.f32.mrf.mxu0 }
 0x138   : > { %v1375_v40 = vadd.f32 %v3680_v16, %v1374_v50  ;;  %3085 = vmatprep.mubr.msk.f32.mxu1 %vm498_vm1, %v1395_v37  ;;  %v1398_v44 = vmax.f32 %v1380_v39, 0.0 }
 0x139   : > { %3086 = vmatmul.mubr.msk.f32.gmra.mxu1 %vm498_vm1, %v1396_v38  ;;  %v3101_v41 = vpop.f32.mrf.mxu0 }
 0x13a   : > { %v1397_v42 = vmax.f32 %v1375_v40, 0.0  ;;  %v1760_v46 = vadd.f32 %v3101_v41, %v3680_v16 }
 0x13b   : > { %v1754_v48 = vpop.f32.mrf.mxu0 }
 0x13c   : > { %v1755_v49 = vadd.f32 %v3680_v16, %v1754_v48  ;;  %3088 = vmatprep.mubr.msk.f32.mxu1 %vm498_vm1, %v1397_v42  ;;  %v1834_v53 = vmax.f32 %v1760_v46, 0.0 }
 0x13d   : > { %3089 = vmatmul.mubr.msk.f32.gmra.mxu1 %vm498_vm1, %v1398_v44  ;;  %v3104_v51 = vpop.f32.mrf.mxu0 }
 0x13e   : > { %v1833_v52 = vmax.f32 %v1755_v49, 0.0  ;;  %v1770_v54 = vadd.f32 %v3104_v51, %v3680_v16 }
 0x13f   : > { %v1764_v55 = vpop.f32.mrf.mxu0 }
 0x140   : > { %v1765_v56 = vadd.f32 %v3680_v16, %v1764_v55  ;;  %3139 = vmatprep.mubr.msk.f32.mxu0 %vm498_vm1, %v1833_v52  ;;  %v1836_v59 = vmax.f32 %v1770_v54, 0.0 }
 0x141   : > { %v3107_v57 = vpop.f32.mrf.mxu0  ;;  %3140 = vmatmul.mubr.msk.f32.vlgmr.msra.gmra.mxu0 %vm498_vm1, %v1834_v53 }
 0x142   : > { %v1835_v58 = vmax.f32 %v1765_v56, 0.0  ;;  %v1780_v60 = vadd.f32 %v3107_v57, %v3680_v16 }
 0x143   : > { %v1774_v61 = vpop.f32.mrf.mxu0 }
 0x144   : > { %v1775_v62 = vadd.f32 %v3680_v16, %v1774_v61  ;;  %3142 = vmatprep.mubr.msk.f32.mxu1 %vm498_vm1, %v1835_v58  ;;  %v1838_v1 = vmax.f32 %v1780_v60, 0.0 }
 0x145   : > { %v3110_v63 = vpop.f32.mrf.mxu0  ;;  %3143 = vmatmul.mubr.msk.f32.vlgmr.msra.gmra.mxu1 %vm498_vm1, %v1836_v59 }
 0x146   : > { %v1837_v0 = vmax.f32 %v1775_v62, 0.0  ;;  %v1790_v2 = vadd.f32 %v3110_v63, %v3680_v16 }
 0x147   : > { %v1784_v3 = vpop.f32.mrf.mxu0 }
 0x148   : > { %v1785_v5 = vadd.f32 %v3680_v16, %v1784_v3  ;;  %3145 = vmatprep.mubr.msk.f32.mxu1 %vm498_vm1, %v1837_v0  ;;  %v1840_v9 = vmax.f32 %v1790_v2, 0.0 }
 0x149   : > { %v3113_v6 = vpop.f32.mrf.mxu0  ;;  %3146 = vmatmul.mubr.msk.f32.gmra.mxu1 %vm498_vm1, %v1838_v1 }
 0x14a   : > { %v1839_v7 = vmax.f32 %v1785_v5, 0.0  ;;  %v1800_v10 = vadd.f32 %v3113_v6, %v3680_v16 }
 0x14b   : > { %v1794_v12 = vpop.f32.mrf.mxu0 }
 0x14c   : > { %v1795_v13 = vadd.f32 %v3680_v16, %v1794_v12  ;;  %3148 = vmatprep.mubr.msk.f32.mxu1 %vm498_vm1, %v1839_v7  ;;  %v1842_v18 = vmax.f32 %v1800_v10, 0.0 }
 0x14d   : > { %v3116_v15 = vpop.f32.mrf.mxu0  ;;  %3149 = vmatmul.mubr.msk.f32.gmra.mxu1 %vm498_vm1, %v1840_v9 }
 0x14e   : > { %v1841_v17 = vmax.f32 %v1795_v13, 0.0  ;;  %v1810_v19 = vadd.f32 %v3116_v15, %v3680_v16 }
 0x14f   : > { %v1804_v20 = vpop.f32.mrf.mxu0 }
 0x150   : > { %v1805_v4 = vadd.f32 %v3680_v16, %v1804_v20  ;;  %3151 = vmatprep.mubr.msk.f32.mxu1 %vm498_vm1, %v1841_v17  ;;  %v1844_v23 = vmax.f32 %v1810_v19, 0.0 }
 0x151   : > { %v3119_v21 = vpop.f32.mrf.mxu0  ;;  %3152 = vmatmul.mubr.msk.f32.gmra.mxu1 %vm498_vm1, %v1842_v18 }
 0x152   : > { %v1843_v22 = vmax.f32 %v1805_v4, 0.0  ;;  %v1820_v8 = vadd.f32 %v3119_v21, %v3680_v16 }
 0x153   : > { %v1814_v24 = vpop.f32.mrf.mxu0 }
 0x154   : > { %v1815_v11 = vadd.f32 %v3680_v16, %v1814_v24  ;;  %3154 = vmatprep.mubr.msk.f32.mxu1 %vm498_vm1, %v1843_v22  ;;  %v1846_v27 = vmax.f32 %v1820_v8, 0.0 }
 0x155   : > { %v3122_v25 = vpop.f32.mrf.mxu0  ;;  %3155 = vmatmul.mubr.msk.f32.gmra.mxu1 %vm498_vm1, %v1844_v23 }
 0x156   : > { %v1845_v26 = vmax.f32 %v1815_v11, 0.0  ;;  %v1830_v14 = vadd.f32 %v3122_v25, %v3680_v16 }
 0x157   : > { %v1824_v28 = vpop.f32.mrf.mxu0 }
 0x158   : > { %v1825_v43 = vadd.f32 %v3680_v16, %v1824_v28  ;;  %3157 = vmatprep.mubr.msk.f32.mxu1 %vm498_vm1, %v1845_v26  ;;  %v1848_v30 = vmax.f32 %v1830_v14, 0.0 }
 0x159   : > { %3158 = vmatmul.mubr.msk.f32.gmra.mxu1 %vm498_vm1, %v1846_v27 }
 0x15a   : > { %v1847_v29 = vmax.f32 %v1825_v43, 0.0 }
 0x15c   : > { %3160 = vmatprep.mubr.msk.f32.mxu1 %vm498_vm1, %v1847_v29 }
 0x15d   : > { %3161 = vmatmul.mubr.msk.f32.gmra.mxu1 %vm498_vm1, %v1848_v30 }
 0x1a1   : > { %v2925_v45 = vpop.f32.mrf.mxu1 }
 0x1a2   : > { %v619_v16 = vadd.f32 %v2925_v45, %v3861_v31 }
 0x1a3   : > { %v613_v32 = vpop.f32.mrf.mxu1 }
 0x1a4   : > { %v693_v33 = vmax.f32 %v619_v16, 0.0  ;;  %v614_v34 = vadd.f32 %v3861_v31, %v613_v32 }
 0x1a5   : > { %v2928_v47 = vpop.f32.mrf.mxu1 }
 0x1a6   : > { %709 = vst.msk [vmem:[%s3865_s24 + $0x8] sm:$0xff] %vm498_vm1, %v693_v33  ;;  %v692_v35 = vmax.f32 %v614_v34, 0.0  ;;  %v629_v36 = vadd.f32 %v2928_v47, %v3861_v31 }
 0x1a7   : > { %v623_v37 = vpop.f32.mrf.mxu1 }
 0x1a8   : > { %708 = vst.msk [vmem:[%s3865_s24] sm:$0xff] %vm498_vm1, %v692_v35  ;;  %v695_v38 = vmax.f32 %v629_v36, 0.0  ;;  %v624_v39 = vadd.f32 %v3861_v31, %v623_v37 }
 0x1a9   : > { %v2931_v50 = vpop.f32.mrf.mxu1 }
 0x1aa   : > { %711 = vst.msk [vmem:[%s3865_s24 + $0x18] sm:$0xff] %vm498_vm1, %v695_v38  ;;  %v694_v40 = vmax.f32 %v624_v39, 0.0  ;;  %v639_v41 = vadd.f32 %v2931_v50, %v3861_v31 }
 0x1ab   : > { %v633_v42 = vpop.f32.mrf.mxu1 }
 0x1ac   : > { %710 = vst.msk [vmem:[%s3865_s24 + $0x10] sm:$0xff] %vm498_vm1, %v694_v40  ;;  %v697_v44 = vmax.f32 %v639_v41, 0.0  ;;  %v634_v46 = vadd.f32 %v3861_v31, %v633_v42 }
 0x1ad   : > { %v2934_v48 = vpop.f32.mrf.mxu1 }
 0x1ae   : > { %713 = vst.msk [vmem:[%s3865_s24 + $0x28] sm:$0xff] %vm498_vm1, %v697_v44  ;;  %v696_v49 = vmax.f32 %v634_v46, 0.0  ;;  %v649_v51 = vadd.f32 %v2934_v48, %v3861_v31 }
 0x1af   : > { %v643_v52 = vpop.f32.mrf.mxu1 }
 0x1b0   : > { %712 = vst.msk [vmem:[%s3865_s24 + $0x20] sm:$0xff] %vm498_vm1, %v696_v49  ;;  %v699_v53 = vmax.f32 %v649_v51, 0.0  ;;  %v644_v54 = vadd.f32 %v3861_v31, %v643_v52 }
 0x1b1   : > { %v2937_v55 = vpop.f32.mrf.mxu1 }
 0x1b2   : > { %715 = vst.msk [vmem:[%s3865_s24 + $0x38] sm:$0xff] %vm498_vm1, %v699_v53  ;;  %v698_v56 = vmax.f32 %v644_v54, 0.0  ;;  %v659_v57 = vadd.f32 %v2937_v55, %v3861_v31 }
 0x1b3   : > { %v653_v58 = vpop.f32.mrf.mxu1 }
 0x1b4   : > { %714 = vst.msk [vmem:[%s3865_s24 + $0x30] sm:$0xff] %vm498_vm1, %v698_v56  ;;  %v701_v59 = vmax.f32 %v659_v57, 0.0  ;;  %v654_v60 = vadd.f32 %v3861_v31, %v653_v58 }
 0x1b5   : > { %v2940_v61 = vpop.f32.mrf.mxu1 }
 0x1b6   : > { %717 = vst.msk [vmem:[%s3865_s24 + $0x48] sm:$0xff] %vm498_vm1, %v701_v59  ;;  %v700_v62 = vmax.f32 %v654_v60, 0.0  ;;  %v669_v63 = vadd.f32 %v2940_v61, %v3861_v31 }
 0x1b7   : > { %v663_v0 = vpop.f32.mrf.mxu1 }
 0x1b8   : > { %716 = vst.msk [vmem:[%s3865_s24 + $0x40] sm:$0xff] %vm498_vm1, %v700_v62  ;;  %v703_v1 = vmax.f32 %v669_v63, 0.0  ;;  %v664_v2 = vadd.f32 %v3861_v31, %v663_v0 }
 0x1b9   : > { %v2943_v3 = vpop.f32.mrf.mxu1 }
 0x1ba   : > { %719 = vst.msk [vmem:[%s3865_s24 + $0x58] sm:$0xff] %vm498_vm1, %v703_v1  ;;  %v702_v5 = vmax.f32 %v664_v2, 0.0  ;;  %v679_v6 = vadd.f32 %v2943_v3, %v3861_v31 }
 0x1bb   : > { %v673_v7 = vpop.f32.mrf.mxu1 }
 0x1bc   : > { %718 = vst.msk [vmem:[%s3865_s24 + $0x50] sm:$0xff] %vm498_vm1, %v702_v5  ;;  %v705_v9 = vmax.f32 %v679_v6, 0.0  ;;  %v674_v10 = vadd.f32 %v3861_v31, %v673_v7 }
 0x1bd   : > { %v2946_v12 = vpop.f32.mrf.mxu1 }
 0x1be   : > { %721 = vst.msk [vmem:[%s3865_s24 + $0x68] sm:$0xff] %vm498_vm1, %v705_v9  ;;  %v704_v13 = vmax.f32 %v674_v10, 0.0  ;;  %v689_v15 = vadd.f32 %v2946_v12, %v3861_v31 }
 0x1bf   : > { %v683_v17 = vpop.f32.mrf.mxu1 }
 0x1c0   : > { %720 = vst.msk [vmem:[%s3865_s24 + $0x60] sm:$0xff] %vm498_vm1, %v704_v13  ;;  %v707_v18 = vmax.f32 %v689_v15, 0.0  ;;  %v684_v19 = vadd.f32 %v3861_v31, %v683_v17 }
 0x1c1   : > { %v2997_v20 = vpop.f32.mrf.mxu1 }
 0x1c2   : > { %723 = vst.msk [vmem:[%s3865_s24 + $0x78] sm:$0xff] %vm498_vm1, %v707_v18  ;;  %v706_v4 = vmax.f32 %v684_v19, 0.0  ;;  %v1069_v21 = vadd.f32 %v2997_v20, %v3861_v31 }
 0x1c3   : > { %v1063_v22 = vpop.f32.mrf.mxu1 }
 0x1c4   : > { %722 = vst.msk [vmem:[%s3865_s24 + $0x70] sm:$0xff] %vm498_vm1, %v706_v4  ;;  %v1143_v23 = vmax.f32 %v1069_v21, 0.0  ;;  %v1064_v8 = vadd.f32 %v3861_v31, %v1063_v22 }
 0x1c5   : > { %v3000_v24 = vpop.f32.mrf.mxu1 }
 0x1c6   : > { %1159 = vst.msk [vmem:[%s3865_s24 + $0x88] sm:$0xff] %vm498_vm1, %v1143_v23  ;;  %v1142_v11 = vmax.f32 %v1064_v8, 0.0  ;;  %v1079_v25 = vadd.f32 %v3000_v24, %v3861_v31 }
 0x1c7   : > { %v1073_v26 = vpop.f32.mrf.mxu1 }
 0x1c8   : > { %1158 = vst.msk [vmem:[%s3865_s24 + $0x80] sm:$0xff] %vm498_vm1, %v1142_v11  ;;  %v1145_v27 = vmax.f32 %v1079_v25, 0.0  ;;  %v1074_v14 = vadd.f32 %v3861_v31, %v1073_v26 }
 0x1c9   : > { %v3003_v28 = vpop.f32.mrf.mxu1 }
 0x1ca   : > { %1161 = vst.msk [vmem:[%s3865_s24 + $0x98] sm:$0xff] %vm498_vm1, %v1145_v27  ;;  %v1144_v43 = vmax.f32 %v1074_v14, 0.0  ;;  %v1089_v29 = vadd.f32 %v3003_v28, %v3861_v31 }
 0x1cb   : > { %v1083_v30 = vpop.f32.mrf.mxu1 }
 0x1cc   : > { %1160 = vst.msk [vmem:[%s3865_s24 + $0x90] sm:$0xff] %vm498_vm1, %v1144_v43  ;;  %v1147_v45 = vmax.f32 %v1089_v29, 0.0  ;;  %v1084_v16 = vadd.f32 %v3861_v31, %v1083_v30 }
 0x1cd   : > { %v3006_v32 = vpop.f32.mrf.mxu1 }
 0x1ce   : > { %1163 = vst.msk [vmem:[%s3865_s24 + $0xa8] sm:$0xff] %vm498_vm1, %v1147_v45  ;;  %v1146_v33 = vmax.f32 %v1084_v16, 0.0  ;;  %v1099_v34 = vadd.f32 %v3006_v32, %v3861_v31 }
 0x1cf   : > { %v1093_v47 = vpop.f32.mrf.mxu1 }
 0x1d0   : > { %1162 = vst.msk [vmem:[%s3865_s24 + $0xa0] sm:$0xff] %vm498_vm1, %v1146_v33  ;;  %v1149_v35 = vmax.f32 %v1099_v34, 0.0  ;;  %v1094_v36 = vadd.f32 %v3861_v31, %v1093_v47 }
 0x1d1   : > { %v3009_v37 = vpop.f32.mrf.mxu1 }
 0x1d2   : > { %1165 = vst.msk [vmem:[%s3865_s24 + $0xb8] sm:$0xff] %vm498_vm1, %v1149_v35  ;;  %v1148_v38 = vmax.f32 %v1094_v36, 0.0  ;;  %v1109_v39 = vadd.f32 %v3009_v37, %v3861_v31 }
 0x1d3   : > { %v1103_v50 = vpop.f32.mrf.mxu1 }
 0x1d4   : > { %1164 = vst.msk [vmem:[%s3865_s24 + $0xb0] sm:$0xff] %vm498_vm1, %v1148_v38  ;;  %v1151_v40 = vmax.f32 %v1109_v39, 0.0  ;;  %v1104_v41 = vadd.f32 %v3861_v31, %v1103_v50 }
 0x1d5   : > { %v3012_v42 = vpop.f32.mrf.mxu1 }
 0x1d6   : > { %1167 = vst.msk [vmem:[%s3865_s24 + $0xc8] sm:$0xff] %vm498_vm1, %v1151_v40  ;;  %v1150_v44 = vmax.f32 %v1104_v41, 0.0  ;;  %v1119_v46 = vadd.f32 %v3012_v42, %v3861_v31 }
 0x1d7   : > { %v1113_v48 = vpop.f32.mrf.mxu1 }
 0x1d8   : > { %1166 = vst.msk [vmem:[%s3865_s24 + $0xc0] sm:$0xff] %vm498_vm1, %v1150_v44  ;;  %v1153_v49 = vmax.f32 %v1119_v46, 0.0  ;;  %v1114_v51 = vadd.f32 %v3861_v31, %v1113_v48 }
 0x1d9   : > { %v3015_v52 = vpop.f32.mrf.mxu1 }
 0x1da   : > { %1169 = vst.msk [vmem:[%s3865_s24 + $0xd8] sm:$0xff] %vm498_vm1, %v1153_v49  ;;  %v1152_v53 = vmax.f32 %v1114_v51, 0.0  ;;  %v1129_v54 = vadd.f32 %v3015_v52, %v3861_v31 }
 0x1db   : > { %v1123_v55 = vpop.f32.mrf.mxu1 }
 0x1dc   : > { %1168 = vst.msk [vmem:[%s3865_s24 + $0xd0] sm:$0xff] %vm498_vm1, %v1152_v53  ;;  %v1155_v56 = vmax.f32 %v1129_v54, 0.0  ;;  %v1124_v57 = vadd.f32 %v3861_v31, %v1123_v55 }
 0x1dd   : > { %v3018_v58 = vpop.f32.mrf.mxu1 }
 0x1de   : > { %1171 = vst.msk [vmem:[%s3865_s24 + $0xe8] sm:$0xff] %vm498_vm1, %v1155_v56  ;;  %v1154_v59 = vmax.f32 %v1124_v57, 0.0  ;;  %v1139_v60 = vadd.f32 %v3018_v58, %v3861_v31 }
 0x1df   : > { %v1133_v61 = vpop.f32.mrf.mxu1 }
 0x1e0   : > { %1170 = vst.msk [vmem:[%s3865_s24 + $0xe0] sm:$0xff] %vm498_vm1, %v1154_v59  ;;  %v1157_v62 = vmax.f32 %v1139_v60, 0.0  ;;  %v1134_v63 = vadd.f32 %v3861_v31, %v1133_v61 }
 0x1e1   : > { %v3069_v0 = vpop.f32.mrf.mxu1 }
 0x1e2   : > { %1173 = vst.msk [vmem:[%s3865_s24 + $0xf8] sm:$0xff] %vm498_vm1, %v1157_v62  ;;  %v1156_v1 = vmax.f32 %v1134_v63, 0.0  ;;  %v1519_v2 = vadd.f32 %v3069_v0, %v3861_v31 }
 0x1e3   : > { %v1513_v3 = vpop.f32.mrf.mxu1 }
 0x1e4   : > { %1172 = vst.msk [vmem:[%s3865_s24 + $0xf0] sm:$0xff] %vm498_vm1, %v1156_v1  ;;  %v1593_v5 = vmax.f32 %v1519_v2, 0.0  ;;  %v1514_v6 = vadd.f32 %v3861_v31, %v1513_v3 }
 0x1e5   : > { %v3072_v7 = vpop.f32.mrf.mxu1 }
 0x1e6   : > { %1609 = vst.msk [vmem:[%s3865_s24 + $0x108] sm:$0xff] %vm498_vm1, %v1593_v5  ;;  %v1592_v9 = vmax.f32 %v1514_v6, 0.0  ;;  %v1529_v10 = vadd.f32 %v3072_v7, %v3861_v31 }
 0x1e7   : > { %v1523_v12 = vpop.f32.mrf.mxu1 }
 0x1e8   : > { %1608 = vst.msk [vmem:[%s3865_s24 + $0x100] sm:$0xff] %vm498_vm1, %v1592_v9  ;;  %v1595_v13 = vmax.f32 %v1529_v10, 0.0  ;;  %v1524_v15 = vadd.f32 %v3861_v31, %v1523_v12 }
 0x1e9   : > { %v3075_v17 = vpop.f32.mrf.mxu1 }
 0x1ea   : > { %1611 = vst.msk [vmem:[%s3865_s24 + $0x118] sm:$0xff] %vm498_vm1, %v1595_v13  ;;  %v1594_v18 = vmax.f32 %v1524_v15, 0.0  ;;  %v1539_v19 = vadd.f32 %v3075_v17, %v3861_v31 }
 0x1eb   : > { %v1533_v20 = vpop.f32.mrf.mxu1 }
 0x1ec   : > { %1610 = vst.msk [vmem:[%s3865_s24 + $0x110] sm:$0xff] %vm498_vm1, %v1594_v18  ;;  %v1597_v4 = vmax.f32 %v1539_v19, 0.0  ;;  %v1534_v21 = vadd.f32 %v3861_v31, %v1533_v20 }
 0x1ed   : > { %v3078_v22 = vpop.f32.mrf.mxu1 }
 0x1ee   : > { %1613 = vst.msk [vmem:[%s3865_s24 + $0x128] sm:$0xff] %vm498_vm1, %v1597_v4  ;;  %v1596_v23 = vmax.f32 %v1534_v21, 0.0  ;;  %v1549_v8 = vadd.f32 %v3078_v22, %v3861_v31 }
 0x1ef   : > { %v1543_v24 = vpop.f32.mrf.mxu1 }
 0x1f0   : > { %1612 = vst.msk [vmem:[%s3865_s24 + $0x120] sm:$0xff] %vm498_vm1, %v1596_v23  ;;  %v1599_v11 = vmax.f32 %v1549_v8, 0.0  ;;  %v1544_v25 = vadd.f32 %v3861_v31, %v1543_v24 }
 0x1f1   : > { %v3081_v26 = vpop.f32.mrf.mxu1 }
 0x1f2   : > { %1615 = vst.msk [vmem:[%s3865_s24 + $0x138] sm:$0xff] %vm498_vm1, %v1599_v11  ;;  %v1598_v27 = vmax.f32 %v1544_v25, 0.0  ;;  %v1559_v14 = vadd.f32 %v3081_v26, %v3861_v31 }
 0x1f3   : > { %v1553_v28 = vpop.f32.mrf.mxu1 }
 0x1f4   : > { %1614 = vst.msk [vmem:[%s3865_s24 + $0x130] sm:$0xff] %vm498_vm1, %v1598_v27  ;;  %v1601_v43 = vmax.f32 %v1559_v14, 0.0  ;;  %v1554_v29 = vadd.f32 %v3861_v31, %v1553_v28 }
 0x1f5   : > { %v3084_v30 = vpop.f32.mrf.mxu1 }
 0x1f6   : > { %1617 = vst.msk [vmem:[%s3865_s24 + $0x148] sm:$0xff] %vm498_vm1, %v1601_v43  ;;  %v1600_v45 = vmax.f32 %v1554_v29, 0.0  ;;  %v1569_v16 = vadd.f32 %v3084_v30, %v3861_v31 }
 0x1f7   : > { %v1563_v32 = vpop.f32.mrf.mxu1 }
 0x1f8   : > { %1616 = vst.msk [vmem:[%s3865_s24 + $0x140] sm:$0xff] %vm498_vm1, %v1600_v45  ;;  %v1603_v33 = vmax.f32 %v1569_v16, 0.0  ;;  %v1564_v34 = vadd.f32 %v3861_v31, %v1563_v32 }
 0x1f9   : > { %v3087_v47 = vpop.f32.mrf.mxu1 }
 0x1fa   : > { %1619 = vst.msk [vmem:[%s3865_s24 + $0x158] sm:$0xff] %vm498_vm1, %v1603_v33  ;;  %v1602_v35 = vmax.f32 %v1564_v34, 0.0  ;;  %v1579_v36 = vadd.f32 %v3087_v47, %v3861_v31 }
 0x1fb   : > { %v1573_v37 = vpop.f32.mrf.mxu1 }
 0x1fc   : > { %1618 = vst.msk [vmem:[%s3865_s24 + $0x150] sm:$0xff] %vm498_vm1, %v1602_v35  ;;  %v1605_v38 = vmax.f32 %v1579_v36, 0.0  ;;  %v1574_v39 = vadd.f32 %v3861_v31, %v1573_v37 }
 0x1fd   : > { %v3090_v50 = vpop.f32.mrf.mxu1 }
 0x1fe   : > { %1621 = vst.msk [vmem:[%s3865_s24 + $0x168] sm:$0xff] %vm498_vm1, %v1605_v38  ;;  %v1604_v40 = vmax.f32 %v1574_v39, 0.0  ;;  %v1589_v41 = vadd.f32 %v3090_v50, %v3861_v31 }
 0x1ff   : > { %v1583_v42 = vpop.f32.mrf.mxu1 }
 0x200   : > { %1620 = vst.msk [vmem:[%s3865_s24 + $0x160] sm:$0xff] %vm498_vm1, %v1604_v40  ;;  %v1607_v44 = vmax.f32 %v1589_v41, 0.0  ;;  %v1584_v46 = vadd.f32 %v3861_v31, %v1583_v42 }
 0x201   : > { %v3141_v48 = vpop.f32.mrf.mxu0 }
 0x202   : > { %1623 = vst.msk [vmem:[%s3865_s24 + $0x178] sm:$0xff] %vm498_vm1, %v1607_v44  ;;  %v1606_v49 = vmax.f32 %v1584_v46, 0.0  ;;  %v1969_v51 = vadd.f32 %v3141_v48, %v3861_v31 }
 0x203   : > { %v1963_v52 = vpop.f32.mrf.mxu0 }
 0x204   : > { %1622 = vst.msk [vmem:[%s3865_s24 + $0x170] sm:$0xff] %vm498_vm1, %v1606_v49  ;;  %v2043_v53 = vmax.f32 %v1969_v51, 0.0  ;;  %v1964_v54 = vadd.f32 %v3861_v31, %v1963_v52 }
 0x205   : > { %v3144_v55 = vpop.f32.mrf.mxu1 }
 0x206   : > { %2059 = vst.msk [vmem:[%s3865_s24 + $0x188] sm:$0xff] %vm498_vm1, %v2043_v53  ;;  %v2042_v56 = vmax.f32 %v1964_v54, 0.0  ;;  %v1979_v57 = vadd.f32 %v3144_v55, %v3861_v31 }
 0x207   : > { %v1973_v58 = vpop.f32.mrf.mxu1 }
 0x208   : > { %2058 = vst.msk [vmem:[%s3865_s24 + $0x180] sm:$0xff] %vm498_vm1, %v2042_v56  ;;  %v2045_v59 = vmax.f32 %v1979_v57, 0.0  ;;  %v1974_v60 = vadd.f32 %v3861_v31, %v1973_v58 }
 0x209   : > { %v3147_v61 = vpop.f32.mrf.mxu1 }
 0x20a   : > { %2061 = vst.msk [vmem:[%s3865_s24 + $0x198] sm:$0xff] %vm498_vm1, %v2045_v59  ;;  %v2044_v62 = vmax.f32 %v1974_v60, 0.0  ;;  %v1989_v63 = vadd.f32 %v3147_v61, %v3861_v31 }
 0x20b   : > { %v1983_v0 = vpop.f32.mrf.mxu1 }
 0x20c   : > { %2060 = vst.msk [vmem:[%s3865_s24 + $0x190] sm:$0xff] %vm498_vm1, %v2044_v62  ;;  %v2047_v1 = vmax.f32 %v1989_v63, 0.0  ;;  %v1984_v2 = vadd.f32 %v3861_v31, %v1983_v0 }
 0x20d   : > { %v3150_v3 = vpop.f32.mrf.mxu1 }
 0x20e   : > { %2063 = vst.msk [vmem:[%s3865_s24 + $0x1a8] sm:$0xff] %vm498_vm1, %v2047_v1  ;;  %v2046_v5 = vmax.f32 %v1984_v2, 0.0  ;;  %v1999_v6 = vadd.f32 %v3150_v3, %v3861_v31 }
 0x20f   : > { %v1993_v7 = vpop.f32.mrf.mxu1 }
 0x210   : > { %2062 = vst.msk [vmem:[%s3865_s24 + $0x1a0] sm:$0xff] %vm498_vm1, %v2046_v5  ;;  %v2049_v9 = vmax.f32 %v1999_v6, 0.0  ;;  %v1994_v10 = vadd.f32 %v3861_v31, %v1993_v7 }
 0x211   : > { %v3153_v12 = vpop.f32.mrf.mxu1 }
 0x212   : > { %2065 = vst.msk [vmem:[%s3865_s24 + $0x1b8] sm:$0xff] %vm498_vm1, %v2049_v9  ;;  %v2048_v13 = vmax.f32 %v1994_v10, 0.0  ;;  %v2009_v15 = vadd.f32 %v3153_v12, %v3861_v31 }
 0x213   : > { %v2003_v17 = vpop.f32.mrf.mxu1 }
 0x214   : > { %2064 = vst.msk [vmem:[%s3865_s24 + $0x1b0] sm:$0xff] %vm498_vm1, %v2048_v13  ;;  %v2051_v18 = vmax.f32 %v2009_v15, 0.0  ;;  %v2004_v19 = vadd.f32 %v3861_v31, %v2003_v17 }
 0x215   : > { %v3156_v20 = vpop.f32.mrf.mxu1 }
 0x216   : > { %2067 = vst.msk [vmem:[%s3865_s24 + $0x1c8] sm:$0xff] %vm498_vm1, %v2051_v18  ;;  %v2050_v4 = vmax.f32 %v2004_v19, 0.0  ;;  %v2019_v21 = vadd.f32 %v3156_v20, %v3861_v31 }
 0x217   : > { %v2013_v22 = vpop.f32.mrf.mxu1 }
 0x218   : > { %2066 = vst.msk [vmem:[%s3865_s24 + $0x1c0] sm:$0xff] %vm498_vm1, %v2050_v4  ;;  %v2053_v23 = vmax.f32 %v2019_v21, 0.0  ;;  %v2014_v8 = vadd.f32 %v3861_v31, %v2013_v22 }
 0x219   : > { %v3159_v24 = vpop.f32.mrf.mxu1 }
 0x21a   : > { %2069 = vst.msk [vmem:[%s3865_s24 + $0x1d8] sm:$0xff] %vm498_vm1, %v2053_v23  ;;  %v2052_v11 = vmax.f32 %v2014_v8, 0.0  ;;  %v2029_v25 = vadd.f32 %v3159_v24, %v3861_v31 }
 0x21b   : > { %v2023_v26 = vpop.f32.mrf.mxu1 }
 0x21c   : > { %2068 = vst.msk [vmem:[%s3865_s24 + $0x1d0] sm:$0xff] %vm498_vm1, %v2052_v11  ;;  %v2055_v27 = vmax.f32 %v2029_v25, 0.0  ;;  %v2024_v14 = vadd.f32 %v3861_v31, %v2023_v26 }
 0x21d   : > { %v3162_v28 = vpop.f32.mrf.mxu1 }
 0x21e   : > { %2071 = vst.msk [vmem:[%s3865_s24 + $0x1e8] sm:$0xff] %vm498_vm1, %v2055_v27  ;;  %v2054_v43 = vmax.f32 %v2024_v14, 0.0  ;;  %v2039_v29 = vadd.f32 %v3162_v28, %v3861_v31 }
 0x21f   : > { %v2033_v30 = vpop.f32.mrf.mxu1 }
 0x220   : > { %2070 = vst.msk [vmem:[%s3865_s24 + $0x1e0] sm:$0xff] %vm498_vm1, %v2054_v43  ;;  %v2057_v45 = vmax.f32 %v2039_v29, 0.0  ;;  %v2034_v16 = vadd.f32 %v3861_v31, %v2033_v30  ;;  %2080 = sbr.rel (!%p3410_p4) target bundleno = 613 (0x265), region = 44 }
 0x222   : > { %2073 = vst.msk [vmem:[%s3865_s24 + $0x1f8] sm:$0xff] %vm498_vm1, %v2057_v45  ;;  %v2056_v32 = vmax.f32 %v2034_v16, 0.0 }
 0x224   : > { %2072 = vst.msk [vmem:[%s3865_s24 + $0x1f0] sm:$0xff] %vm498_vm1, %v2056_v32 }
 0x225   : > { %s4279_s18 = smov (!%p2083_p8, %s2082_s18), 64 }
 0x226   : > { %s2681_s7 = sshll.u32 %s4279_s18, 7 }
 0x227   : > { %p2684_p9 = scmp.eq.s32.totalorder %s2681_s7, 0 }
 0x228   : > { %s4070_s8 = sshrl.u32 (!%p2684_p9), %s4279_s18, 6 }
 0x229   : > { %2091 = sbr.rel (%p2684_p9) target bundleno = 613 (0x265), region = 48  ;;  %p2685_p10 = scmp.le.s32.totalorder (!%p2684_p9), %s4070_s8, 0 }
 0x22e   : > { %2498 = sbr.rel (%p2685_p10) target bundleno = 596 (0x254), region = 124  ;;  %s4270_s21 = smov (!%p2685_p10), %s4064_s30 }
 0x22f   : > { %s4271_s26 = smov (!%p2685_p10), %s3865_s24  ;;  %s4079_s6 = smov (!%p2685_p10), 0  }
 0x230   : > { %s4081_s9 = smov (!%p2685_p10), 0  }
 0x233 LB: >> { %v2280_v31 = vld [vmem:[%s3329_s26] sm:$0xff]  ;;  %v2282_v33 = vld [vmem:[%s3329_s26 + $0x8] sm:$0xff]  ;;  %v2284_v34 = vld [vmem:[%s3329_s26 + $0x10] sm:$0xff]  ;;  %s2408_s10 = sadd.s32 1, %s3333_s6  ;;  %s2274_s9 = sadd.s32 1, %s3337_s9   ;;  %s3337_s9 = sphi %s4081_s9, %s2274_s9   ;;  %s3333_s6 = sphi %s4079_s6, %s4274_s6   ;;  %s3329_s26 = sphi %s4271_s26, %s4273_s26   ;;  %s3325_s21 = sphi %s4270_s21, %s4272_s21  }
 0x234   : >> { %2281 = vst [vmem:[%s3325_s21] sm:$0xff] %v2280_v31  ;;  %2283 = vst [vmem:[%s3325_s21 + $0x8] sm:$0xff] %v2282_v33  ;;  %v2286_v47 = vld [vmem:[%s3329_s26 + $0x18] sm:$0xff]  ;;  %v2288_v35 = vld [vmem:[%s3329_s26 + $0x20] sm:$0xff]  ;;  %p2409_p11 = scmp.ge.s32.totalorder %s2408_s10, %s4070_s8  ;;  %p2273_p12 = scmp.ge.s32.totalorder %s2274_s9, %s4070_s8 }
 0x235   : >> { %2285 = vst [vmem:[%s3325_s21 + $0x10] sm:$0xff] %v2284_v34  ;;  %v2290_v36 = vld [vmem:[%s3329_s26 + $0x28] sm:$0xff]  ;;  %2287 = vst [vmem:[%s3325_s21 + $0x18] sm:$0xff] %v2286_v47  ;;  %v2292_v37 = vld [vmem:[%s3329_s26 + $0x30] sm:$0xff] }
 0x236   : >> { %2289 = vst [vmem:[%s3325_s21 + $0x20] sm:$0xff] %v2288_v35  ;;  %2291 = vst [vmem:[%s3325_s21 + $0x28] sm:$0xff] %v2290_v36  ;;  %v2294_v38 = vld [vmem:[%s3329_s26 + $0x38] sm:$0xff]  ;;  %v2296_v39 = vld [vmem:[%s3329_s26 + $0x40] sm:$0xff]  ;;  %s4281_s10 = smov (%p2409_p11, %s2408_s10), 0 }
 0x237   : >> { %2293 = vst [vmem:[%s3325_s21 + $0x30] sm:$0xff] %v2292_v37  ;;  %2295 = vst [vmem:[%s3325_s21 + $0x38] sm:$0xff] %v2294_v38  ;;  %v2298_v50 = vld [vmem:[%s3329_s26 + $0x48] sm:$0xff]  ;;  %v2300_v40 = vld [vmem:[%s3329_s26 + $0x50] sm:$0xff]  ;;  %s2686_s11 = sshll.u32 %s4281_s10, 9  ;;  %s4274_s6 = smov %s4281_s10 }
 0x238   : >> { %2297 = vst [vmem:[%s3325_s21 + $0x40] sm:$0xff] %v2296_v39  ;;  %v2302_v41 = vld [vmem:[%s3329_s26 + $0x58] sm:$0xff]  ;;  %2299 = vst [vmem:[%s3325_s21 + $0x48] sm:$0xff] %v2298_v50  ;;  %v2304_v42 = vld [vmem:[%s3329_s26 + $0x60] sm:$0xff]  ;;  %s4137_s12 = scalar_lea.vmem %s3865_s24, %s2686_s11 [#allocation2]   ;;  %s4140_s13 = scalar_lea.vmem %s4064_s30, %s2686_s11  }
 0x239   : >> { %2301 = vst [vmem:[%s3325_s21 + $0x50] sm:$0xff] %v2300_v40  ;;  %2303 = vst [vmem:[%s3325_s21 + $0x58] sm:$0xff] %v2302_v41  ;;  %v2306_v44 = vld [vmem:[%s3329_s26 + $0x68] sm:$0xff]  ;;  %v2308_v46 = vld [vmem:[%s3329_s26 + $0x70] sm:$0xff] }
 0x23a   : >> { %2305 = vst [vmem:[%s3325_s21 + $0x60] sm:$0xff] %v2304_v42  ;;  %2307 = vst [vmem:[%s3325_s21 + $0x68] sm:$0xff] %v2306_v44  ;;  %v2310_v48 = vld [vmem:[%s3329_s26 + $0x78] sm:$0xff]  ;;  %v2312_v49 = vld [vmem:[%s3329_s26 + $0x80] sm:$0xff] }
 0x23b   : >> { %2309 = vst [vmem:[%s3325_s21 + $0x70] sm:$0xff] %v2308_v46  ;;  %v2314_v51 = vld [vmem:[%s3329_s26 + $0x88] sm:$0xff]  ;;  %2311 = vst [vmem:[%s3325_s21 + $0x78] sm:$0xff] %v2310_v48  ;;  %v2316_v52 = vld [vmem:[%s3329_s26 + $0x90] sm:$0xff] }
 0x23c   : >> { %2313 = vst [vmem:[%s3325_s21 + $0x80] sm:$0xff] %v2312_v49  ;;  %2315 = vst [vmem:[%s3325_s21 + $0x88] sm:$0xff] %v2314_v51  ;;  %v2318_v53 = vld [vmem:[%s3329_s26 + $0x98] sm:$0xff]  ;;  %v2320_v54 = vld [vmem:[%s3329_s26 + $0xa0] sm:$0xff] }
 0x23d   : >> { %2317 = vst [vmem:[%s3325_s21 + $0x90] sm:$0xff] %v2316_v52  ;;  %2319 = vst [vmem:[%s3325_s21 + $0x98] sm:$0xff] %v2318_v53  ;;  %v2322_v55 = vld [vmem:[%s3329_s26 + $0xa8] sm:$0xff]  ;;  %v2324_v56 = vld [vmem:[%s3329_s26 + $0xb0] sm:$0xff] }
 0x23e   : >> { %2321 = vst [vmem:[%s3325_s21 + $0xa0] sm:$0xff] %v2320_v54  ;;  %v2326_v57 = vld [vmem:[%s3329_s26 + $0xb8] sm:$0xff]  ;;  %2323 = vst [vmem:[%s3325_s21 + $0xa8] sm:$0xff] %v2322_v55  ;;  %v2328_v58 = vld [vmem:[%s3329_s26 + $0xc0] sm:$0xff] }
 0x23f   : >> { %2325 = vst [vmem:[%s3325_s21 + $0xb0] sm:$0xff] %v2324_v56  ;;  %2327 = vst [vmem:[%s3325_s21 + $0xb8] sm:$0xff] %v2326_v57  ;;  %v2330_v59 = vld [vmem:[%s3329_s26 + $0xc8] sm:$0xff]  ;;  %v2332_v60 = vld [vmem:[%s3329_s26 + $0xd0] sm:$0xff] }
 0x240   : >> { %2329 = vst [vmem:[%s3325_s21 + $0xc0] sm:$0xff] %v2328_v58  ;;  %2331 = vst [vmem:[%s3325_s21 + $0xc8] sm:$0xff] %v2330_v59  ;;  %v2334_v61 = vld [vmem:[%s3329_s26 + $0xd8] sm:$0xff]  ;;  %v2336_v62 = vld [vmem:[%s3329_s26 + $0xe0] sm:$0xff] }
 0x241   : >> { %2333 = vst [vmem:[%s3325_s21 + $0xd0] sm:$0xff] %v2332_v60  ;;  %v2338_v63 = vld [vmem:[%s3329_s26 + $0xe8] sm:$0xff]  ;;  %2335 = vst [vmem:[%s3325_s21 + $0xd8] sm:$0xff] %v2334_v61  ;;  %v2340_v0 = vld [vmem:[%s3329_s26 + $0xf0] sm:$0xff] }
 0x242   : >> { %2337 = vst [vmem:[%s3325_s21 + $0xe0] sm:$0xff] %v2336_v62  ;;  %2339 = vst [vmem:[%s3325_s21 + $0xe8] sm:$0xff] %v2338_v63  ;;  %v2342_v1 = vld [vmem:[%s3329_s26 + $0xf8] sm:$0xff]  ;;  %v2344_v2 = vld [vmem:[%s3329_s26 + $0x100] sm:$0xff] }
 0x243   : >> { %2341 = vst [vmem:[%s3325_s21 + $0xf0] sm:$0xff] %v2340_v0  ;;  %2343 = vst [vmem:[%s3325_s21 + $0xf8] sm:$0xff] %v2342_v1  ;;  %v2346_v3 = vld [vmem:[%s3329_s26 + $0x108] sm:$0xff]  ;;  %v2348_v5 = vld [vmem:[%s3329_s26 + $0x110] sm:$0xff] }
 0x244   : >> { %2345 = vst [vmem:[%s3325_s21 + $0x100] sm:$0xff] %v2344_v2  ;;  %v2350_v6 = vld [vmem:[%s3329_s26 + $0x118] sm:$0xff]  ;;  %2347 = vst [vmem:[%s3325_s21 + $0x108] sm:$0xff] %v2346_v3  ;;  %v2352_v7 = vld [vmem:[%s3329_s26 + $0x120] sm:$0xff] }
 0x245   : >> { %2349 = vst [vmem:[%s3325_s21 + $0x110] sm:$0xff] %v2348_v5  ;;  %2351 = vst [vmem:[%s3325_s21 + $0x118] sm:$0xff] %v2350_v6  ;;  %v2354_v9 = vld [vmem:[%s3329_s26 + $0x128] sm:$0xff]  ;;  %v2356_v10 = vld [vmem:[%s3329_s26 + $0x130] sm:$0xff] }
 0x246   : >> { %2353 = vst [vmem:[%s3325_s21 + $0x120] sm:$0xff] %v2352_v7  ;;  %2355 = vst [vmem:[%s3325_s21 + $0x128] sm:$0xff] %v2354_v9  ;;  %v2358_v12 = vld [vmem:[%s3329_s26 + $0x138] sm:$0xff]  ;;  %v2360_v13 = vld [vmem:[%s3329_s26 + $0x140] sm:$0xff] }
 0x247   : >> { %2357 = vst [vmem:[%s3325_s21 + $0x130] sm:$0xff] %v2356_v10  ;;  %v2362_v15 = vld [vmem:[%s3329_s26 + $0x148] sm:$0xff]  ;;  %2359 = vst [vmem:[%s3325_s21 + $0x138] sm:$0xff] %v2358_v12  ;;  %v2364_v17 = vld [vmem:[%s3329_s26 + $0x150] sm:$0xff] }
 0x248   : >> { %2361 = vst [vmem:[%s3325_s21 + $0x140] sm:$0xff] %v2360_v13  ;;  %2363 = vst [vmem:[%s3325_s21 + $0x148] sm:$0xff] %v2362_v15  ;;  %v2366_v18 = vld [vmem:[%s3329_s26 + $0x158] sm:$0xff]  ;;  %v2368_v19 = vld [vmem:[%s3329_s26 + $0x160] sm:$0xff] }
 0x249   : >> { %2365 = vst [vmem:[%s3325_s21 + $0x150] sm:$0xff] %v2364_v17  ;;  %2367 = vst [vmem:[%s3325_s21 + $0x158] sm:$0xff] %v2366_v18  ;;  %v2370_v20 = vld [vmem:[%s3329_s26 + $0x168] sm:$0xff]  ;;  %v2372_v4 = vld [vmem:[%s3329_s26 + $0x170] sm:$0xff] }
 0x24a   : >> { %2369 = vst [vmem:[%s3325_s21 + $0x160] sm:$0xff] %v2368_v19  ;;  %v2374_v21 = vld [vmem:[%s3329_s26 + $0x178] sm:$0xff]  ;;  %2371 = vst [vmem:[%s3325_s21 + $0x168] sm:$0xff] %v2370_v20  ;;  %v2376_v22 = vld [vmem:[%s3329_s26 + $0x180] sm:$0xff] }
 0x24b   : >> { %2373 = vst [vmem:[%s3325_s21 + $0x170] sm:$0xff] %v2372_v4  ;;  %2375 = vst [vmem:[%s3325_s21 + $0x178] sm:$0xff] %v2374_v21  ;;  %v2378_v23 = vld [vmem:[%s3329_s26 + $0x188] sm:$0xff]  ;;  %v2380_v8 = vld [vmem:[%s3329_s26 + $0x190] sm:$0xff] }
 0x24c   : >> { %2377 = vst [vmem:[%s3325_s21 + $0x180] sm:$0xff] %v2376_v22  ;;  %2379 = vst [vmem:[%s3325_s21 + $0x188] sm:$0xff] %v2378_v23  ;;  %v2382_v24 = vld [vmem:[%s3329_s26 + $0x198] sm:$0xff]  ;;  %v2384_v11 = vld [vmem:[%s3329_s26 + $0x1a0] sm:$0xff] }
 0x24d   : >> { %2381 = vst [vmem:[%s3325_s21 + $0x190] sm:$0xff] %v2380_v8  ;;  %v2386_v25 = vld [vmem:[%s3329_s26 + $0x1a8] sm:$0xff]  ;;  %2383 = vst [vmem:[%s3325_s21 + $0x198] sm:$0xff] %v2382_v24  ;;  %v2388_v26 = vld [vmem:[%s3329_s26 + $0x1b0] sm:$0xff] }
 0x24e   : >> { %2385 = vst [vmem:[%s3325_s21 + $0x1a0] sm:$0xff] %v2384_v11  ;;  %2387 = vst [vmem:[%s3325_s21 + $0x1a8] sm:$0xff] %v2386_v25  ;;  %v2390_v27 = vld [vmem:[%s3329_s26 + $0x1b8] sm:$0xff]  ;;  %v2392_v14 = vld [vmem:[%s3329_s26 + $0x1c0] sm:$0xff] }
 0x24f   : >> { %2389 = vst [vmem:[%s3325_s21 + $0x1b0] sm:$0xff] %v2388_v26  ;;  %2391 = vst [vmem:[%s3325_s21 + $0x1b8] sm:$0xff] %v2390_v27  ;;  %v2394_v28 = vld [vmem:[%s3329_s26 + $0x1c8] sm:$0xff]  ;;  %v2396_v43 = vld [vmem:[%s3329_s26 + $0x1d0] sm:$0xff]  ;;  %2276 = sbr.rel (!%p2273_p12) target bundleno = 563 (0x233), region = 130 }
 0x250   : >> { %2393 = vst [vmem:[%s3325_s21 + $0x1c0] sm:$0xff] %v2392_v14  ;;  %v2398_v29 = vld [vmem:[%s3329_s26 + $0x1d8] sm:$0xff]  ;;  %2395 = vst [vmem:[%s3325_s21 + $0x1c8] sm:$0xff] %v2394_v28  ;;  %v2400_v30 = vld [vmem:[%s3329_s26 + $0x1e0] sm:$0xff] }
 0x251   : >> { %2397 = vst [vmem:[%s3325_s21 + $0x1d0] sm:$0xff] %v2396_v43  ;;  %2399 = vst [vmem:[%s3325_s21 + $0x1d8] sm:$0xff] %v2398_v29  ;;  %v2402_v45 = vld [vmem:[%s3329_s26 + $0x1e8] sm:$0xff]  ;;  %v2404_v16 = vld [vmem:[%s3329_s26 + $0x1f0] sm:$0xff] }
 0x252   : >> { %2401 = vst [vmem:[%s3325_s21 + $0x1e0] sm:$0xff] %v2400_v30  ;;  %2403 = vst [vmem:[%s3325_s21 + $0x1e8] sm:$0xff] %v2402_v45  ;;  %v2406_v32 = vld [vmem:[%s3329_s26 + $0x1f8] sm:$0xff]  ;;  %s4273_s26 = smov %s4137_s12 }
 0x253   : >> { %2405 = vst [vmem:[%s3325_s21 + $0x1f0] sm:$0xff] %v2404_v16  ;;  %2407 = vst [vmem:[%s3325_s21 + $0x1f8] sm:$0xff] %v2406_v32  ;;  %s4272_s21 = smov %s4140_s13 }
 0x254 PF: > { %s4245_s14 = sand.u32 63, %s4279_s18   ;;  %s2697_s15 = sshll.u32 %s4070_s8, 9 }
 0x255   : > { %s2419_s16 = scalar_lea.vmem %s3865_s24, %s2697_s15 [#allocation2]   ;;  %s2421_s17 = scalar_lea.vmem %s4064_s30, %s2697_s15  }
 0x256   : > { %p2691_p13 = scmp.le.s32.totalorder %s4245_s14, 0 }
 0x257   : > { %s3339_s20 = smov (!%p2691_p13), %s2421_s17   ;;  %s3343_s23 = smov (!%p2691_p13), %s2419_s16  }
 0x258   : > { %2512 = sbr.rel (%p2691_p13) target bundleno = 613 (0x265), region = 135  ;;  %s3347_s27 = smov (!%p2691_p13), 0  }
 0x259   : > { %s3351_s28 = smov (!%p2691_p13), 0  }
 0x25d LB: >> { %v2431_v31 = vld [vmem:[%s3345_s23] sm:$0xff]  ;;  %s2433_s18 = sadd.s32 1, %s3349_s27  ;;  %s2425_s28 = sadd.s32 1, %s3353_s28   ;;  %s3353_s28 = sphi %s3351_s28, %s2425_s28   ;;  %s3349_s27 = sphi %s3347_s27, %s3348_s27   ;;  %s3345_s23 = sphi %s3343_s23, %s2438_s23   ;;  %s3341_s20 = sphi %s3339_s20, %s2439_s20  }
 0x25e   : >> { %2432 = vst [vmem:[%s3341_s20] sm:$0xff] %v2431_v31  ;;  %p2434_p0 = scmp.ge.s32.totalorder %s2433_s18, %s4245_s14  ;;  %p2424_p1 = scmp.ge.s32.totalorder %s2425_s28, %s4245_s14 }
 0x260   : >> { %s4283_s18 = smov (%p2434_p0, %s2433_s18), 0  ;;  %2427 = sbr.rel (!%p2424_p1) target bundleno = 605 (0x25d), region = 141 }
 0x261   : >> { %s2692_s24 = sshll.u32 %s4283_s18, 3  ;;  %s3348_s27 = smov %s4283_s18  }
 0x262   : >> { %s2438_s23 = scalar_lea.vmem %s2419_s16, %s2692_s24 [#allocation2]   ;;  %s2439_s20 = scalar_lea.vmem %s2421_s17, %s2692_s24  }
 0x265 PF: > { %p12_p2 = scmp.ge.s32.totalorder %s3400_s22, 4   ;;  %s4275_s18 = smov %s3317_s19 }
 0x266   : > { %s4276_s19 = smov %s3408_s25  ;;  %s4277_s20 = smov %s3400_s22 }
 0x267   :  { %14 = sbr.rel (!%p12_p2) target bundleno = 2 (0x2), region = 152 }

</bundles_post_ra>
